<compile_context>
chip_gen: v5e
topology: v5e:2x2
jax: 0.10.0
libtpu: 0.0.40
codegen_flags: <defaults>
</compile_context>

<pallas_src>
import functools

import jax
import jax.numpy as jnp
from jax.experimental import pallas as pl
from jax.experimental.pallas import tpu as pltpu

# ---- module constants (from Mono2D.__init__) --------------------------------
_MIN_WL = 3.0
_MAX_WL = 128.0
_CUT_OFF = 0.5
_G = 10
_T = 0.0
_EPS = 1e-4        # module `episilon`
_TINY = 1e-30      # guards 0/0 in atan argument
_BIG = 3.0e38

_PI = 3.14159265358979323846
_PIO2 = 1.57079632679489661923
_PIO4 = 0.78539816339744830962
_TAN3PIO8 = 2.414213562373095


# ---- in-kernel math helpers (only ops with guaranteed Mosaic lowering) -------
def _atan(x):
    # Cephes-style float32 arctan, branch-free.
    ax = jnp.abs(x)
    big = ax > _TAN3PIO8
    mid = jnp.logical_and(ax > 0.4142135623730950, jnp.logical_not(big))
    xr = jnp.where(
        big,
        -1.0 / jnp.where(big, ax, 1.0),
        jnp.where(mid, (ax - 1.0) / (ax + 1.0), ax),
    )
    y0 = jnp.where(big, _PIO2, jnp.where(mid, _PIO4, 0.0))
    z = xr * xr
    poly = (((8.05374449538e-2 * z - 1.38776856032e-1) * z
             + 1.99777106478e-1) * z - 3.33329491539e-1) * z * xr + xr
    r = y0 + poly
    return jnp.where(x < 0.0, -r, r)


def _atan2(y, x):
    safe_x = jnp.where(x == 0.0, 1.0, x)
    z = _atan(y / safe_x)
    z = jnp.where(x < 0.0, jnp.where(y >= 0.0, z + _PI, z - _PI), z)
    z = jnp.where(
        x == 0.0,
        jnp.where(y > 0.0, _PIO2, jnp.where(y < 0.0, -_PIO2, 0.0)),
        z,
    )
    return z


def _scale_max_min_packed(v, lane, bt, w):
    """Per-batch min-max scaling over each (R, W) lane segment of a packed slab."""
    def _scale(m):
        if m is None:
            sel_max = v
            sel_min = v
        else:
            sel_max = jnp.where(m, v, -_BIG)
            sel_min = jnp.where(m, v, _BIG)
        vmax = jnp.max(jnp.max(sel_max, axis=1, keepdims=True), axis=0, keepdims=True)
        vmin = jnp.min(jnp.min(sel_min, axis=1, keepdims=True), axis=0, keepdims=True)
        rng = vmax - vmin
        inv = pl.reciprocal(jnp.where(rng == 0.0, 1.0, rng))  # scalar, EUP
        return (v - vmin) * inv

    if bt == 1:
        return _scale(None)
    out = jnp.zeros_like(v)
    for b in range(bt):
        m = jnp.logical_and(lane >= b * w, lane < (b + 1) * w)
        out = out + jnp.where(m, _scale(m), 0.0)
    return out


# ---- Pallas kernel -----------------------------------------------------------
def _mono2d_kernel(x_ref, lg_ref, lghre_ref, lghim_ref,
                   fr_re_ref, fr_im_ref, fi_re_ref, fi_im_ref,
                   fc_re_ref, fc_im_ref, mred_ref,
                   out_ref, stack_ref, *, r, bt, w):
    dot = functools.partial(jnp.dot, preferred_element_type=jnp.float32)
    bf16 = jnp.bfloat16

    x = x_ref[...]            # (R, N) packed real planes, bf16, N = BT*C*W
    lg = lg_ref[...]          # (R, N) log-Gabor filter                 (f32)
    lgh_re = lghre_ref[...]   # (R, N) log-Gabor * Riesz H (real part)  (f32)
    lgh_im = lghim_ref[...]   # (R, N) log-Gabor * Riesz H (imag part)  (f32)
    fr_re = fr_re_ref[...]    # (R, R) forward row DFT                  (f32)
    fr_im = fr_im_ref[...]
    fi_re = fi_re_ref[...]    # (R, R) inverse row DFT, pre-scaled 1/(R*W)
    fi_im = fi_im_ref[...]
    fc_re = fc_re_ref[...]    # (N, N) block-diag column DFT (I_P kron Fc), bf16
    fc_im = fc_im_ref[...]
    mred = mred_ref[...]      # (N, BT*W) 0/1 channel-reduction matrix  (f32)

    # ---- forward FFT2, column-first (X is real):  C = X @ FcBD ;  IM = Fr @ C
    c_re = dot(x, fc_re)                           # 2 dense bf16 matmuls
    c_im = dot(x, fc_im)
    im_re = dot(fr_re, c_re) - dot(fr_im, c_im)    # cheap (R,R) matmuls, f32
    im_im = dot(fr_re, c_im) + dot(fr_im, c_re)

    # ---- band-pass (log-Gabor) and Riesz (H) filtering (lg*H pre-combined)
    z_re = im_re * lg
    z_im = im_im * lg
    p_re = im_re * lgh_re - im_im * lgh_im
    p_im = im_re * lgh_im + im_im * lgh_re

    # ---- inverse FFT2, row-first:  ifft2(Y) = (conj(Fr)/(R*W)) @ Y @ conj(FcBD)
    az_re = dot(fi_re, z_re) + dot(fi_im, z_im)
    az_im = dot(fi_re, z_im) - dot(fi_im, z_re)
    ap_re = dot(fi_re, p_re) + dot(fi_im, p_im)
    ap_im = dot(fi_re, p_im) - dot(fi_im, p_re)

    az_re16, az_im16 = az_re.astype(bf16), az_im.astype(bf16)
    ap_re16, ap_im16 = ap_re.astype(bf16), ap_im.astype(bf16)
    f_pl = dot(az_re16, fc_re) + dot(az_im16, fc_im)    # Re(ifft2(IM*lgf))     -> f
    h1_pl = dot(ap_re16, fc_re) + dot(ap_im16, fc_im)   # Re(ifft2(IM*lgf*H))   -> h1
    h2_pl = dot(ap_im16, fc_re) - dot(ap_re16, fc_im)   # Im(ifft2(IM*lgf*H))   -> h2

    amp2 = h1_pl * h1_pl + h2_pl * h2_pl
    an_pl = jnp.sqrt(f_pl * f_pl + amp2)
    sym_pl = jnp.sqrt(amp2) - jnp.abs(f_pl)

    # ---- fused channel reduction: one (5R,N) x (N,BT*W) MXU matmul (exact, f32)
    stack_ref[pl.ds(0 * r, r), :] = f_pl
    stack_ref[pl.ds(1 * r, r), :] = h1_pl
    stack_ref[pl.ds(2 * r, r), :] = h2_pl
    stack_ref[pl.ds(3 * r, r), :] = an_pl
    stack_ref[pl.ds(4 * r, r), :] = sym_pl
    red = dot(stack_ref[...], mred)                     # (5R, BT*W)

    f_s = red[0 * r:1 * r]
    h1_s = red[1 * r:2 * r]
    h2_s = red[2 * r:3 * r]
    an_s = red[3 * r:4 * r]
    sym_s = red[4 * r:5 * r]

    phase_asym = jnp.maximum(sym_s - _T, 0.0) * pl.reciprocal(an_s + _EPS)
    ori = _atan2(-h2_s, h1_s)
    ft = _atan(f_s * jax.lax.rsqrt(h1_s * h1_s + h2_s * h2_s + _TINY))

    lane = jax.lax.broadcasted_iota(jnp.int32, ft.shape, 1)
    out_ref[pl.ds(0 * r, r), :] = _scale_max_min_packed(ft, lane, bt, w)
    out_ref[pl.ds(1 * r, r), :] = _scale_max_min_packed(ori, lane, bt, w)
    out_ref[pl.ds(2 * r, r), :] = phase_asym


# ---- filter construction glue (plain JAX, mirrors the torch code) ------------
def _mesh_range(rows, cols):
    if cols % 2:
        xr = jnp.arange(-(cols - 1) / 2, cols / 2, dtype=jnp.float32) / (cols - 1)
    else:
        xr = jnp.arange(-cols / 2, cols / 2, dtype=jnp.float32) / cols
    if rows % 2:
        yr = jnp.arange(-(rows - 1) / 2, rows / 2, dtype=jnp.float32) / (rows - 1)
    else:
        yr = jnp.arange(-rows / 2, rows / 2, dtype=jnp.float32) / rows
    u1, u2 = jnp.meshgrid(xr, yr, indexing="xy")
    u1 = jnp.fft.ifftshift(u1)
    u2 = jnp.fft.ifftshift(u2)
    radius = jnp.sqrt(u1 * u1 + u2 * u2)
    return u1, u2, radius


def _get_filters(rows, cols, wls, sigmaonf):
    u1, u2, radius = _mesh_range(rows, cols)
    radius = radius.at[0, 0].set(1.0)
    # H = (1j*u1 - u2) / radius
    h_re = -u2 / radius
    h_im = u1 / radius
    # lowpassfilter (fresh radius with radius[0,0] == 0)
    _, _, radius_lp = _mesh_range(rows, cols)
    lp = 1.0 / (1.0 + (radius_lp / _CUT_OFF) ** (2 * _G))
    # log-Gabor, shape (nscale, rows, cols)
    fo = (1.0 / wls).reshape(-1, 1, 1)
    lgf = jnp.exp(-jnp.log(radius / fo) ** 2 / (2.0 * jnp.log(sigmaonf) ** 2))
    lgf = lgf * lp
    # faithful to the literal torch `lgf[0, 0] = 0` (zeroes row 0 of scale 0)
    lgf = lgf.at[0, 0].set(0.0)
    return h_re, h_im, lgf


def _dft_matrices(n):
    k = jnp.arange(n, dtype=jnp.float32)
    ang = (-2.0 * jnp.pi / n) * jnp.outer(k, k)
    return jnp.cos(ang), jnp.sin(ang)


@functools.lru_cache(maxsize=None)
def _shape_constants(R, W, C, BT):
    """Shape-only constants (DFT matrices, block-diag column DFT, reduction
    matrix), cached across calls so the N^2 kron is not rebuilt every forward."""
    P = BT * C
    fr_re, fr_im = _dft_matrices(R)               # (R, R) forward row DFT
    fc_re, fc_im = _dft_matrices(W)               # (W, W), symmetric
    s = 1.0 / (R * W)                             # ifft normalisation, folded in
    fi_re, fi_im = fr_re * s, fr_im * s
    eye_p = jnp.eye(P, dtype=jnp.float32)
    # TODO(synk): for W >= 128 apply Fc per plane (grid over B*C) instead of the
    # kron to avoid BT*C x redundant MXU FLOPs and the (N,N) constants.
    fcbd_re = jnp.kron(eye_p, fc_re).astype(jnp.bfloat16)   # (N, N) block-diag
    fcbd_im = jnp.kron(eye_p, fc_im).astype(jnp.bfloat16)
    # 0/1 matrix summing the C planes of each batch element: (N, BT*W)
    mred = jnp.kron(jnp.eye(BT, dtype=jnp.float32),
                    jnp.kron(jnp.ones((C, 1), jnp.float32),
                             jnp.eye(W, dtype=jnp.float32)))
    return fr_re, fr_im, fi_re, fi_im, fcbd_re, fcbd_im, mred


def _pick_batch_tile(B, C, W):
    """Smallest batch tile whose packed input (BT*C*W) and reduced output (BT*W)
    lane widths are 128-aligned, preferring a grid of length >= 2 so both v7x
    TensorCores are busy.  Falls back to BT = B (full-array blocks are legal)."""
    for bt in range(1, B):
        if B % bt:
            continue
        if (bt * C * W) % 128 == 0 and (bt * W) % 128 == 0:
            return bt
    return B


# ---- forward wrapper ----------------------------------------------------------
def mono2d_forward(x, wls_raw, sigmaonf_raw, *,
                   return_phase=True, return_phase_asym=False,
                   return_ori=False, return_input=False, fuse=False):
    x = x.astype(jnp.float32)
    B, C, R, W = x.shape

    # get_wls() / get_sigmaonf()
    wls = _MIN_WL + jax.nn.sigmoid(wls_raw.astype(jnp.float32)) * (_MAX_WL - _MIN_WL)
    sig = jax.nn.sigmoid(sigmaonf_raw.astype(jnp.float32)).reshape(())

    h_re, h_im, lgf = _get_filters(R, W, wls, sig)   # (R,W), (R,W), (nscale,R,W)
    nscale = lgf.shape[0]
    if nscale == 1:
        lgf_cw = jnp.tile(lgf[0], (1, C))                            # (R, C*W)
    elif nscale == C:
        lgf_cw = jnp.transpose(lgf, (1, 0, 2)).reshape(R, C * W)     # per-channel scale
    else:
        raise ValueError(
            f"nscale must be 1 or equal to C (got nscale={nscale}, C={C}); "
            "the torch broadcast IM * lgf would fail for other values too.")

    BT = _pick_batch_tile(B, C, W)   # batch elements per grid step
    G = B // BT
    P = BT * C                       # image planes packed per grid step
    N = P * W                        # packed lane width
    BTW = BT * W                     # reduced-output lane width per grid step

    # filter slabs, lane-tiled per plane; Riesz filter pre-multiplied by log-Gabor
    h_re_cw = jnp.tile(h_re, (1, C))
    h_im_cw = jnp.tile(h_im, (1, C))
    lg_slab = jnp.tile(lgf_cw, (1, BT))                     # (R, N) f32
    lghre_slab = jnp.tile(lgf_cw * h_re_cw, (1, BT))        # (R, N) f32
    lghim_slab = jnp.tile(lgf_cw * h_im_cw, (1, BT))        # (R, N) f32

    fr_re, fr_im, fi_re, fi_im, fcbd_re, fcbd_im, mred = _shape_constants(R, W, C, BT)

    # pack (B, C, R, W) -> (R, B*C*W): lane index = (b*C + c)*W + w ; bf16 MXU feed
    x_packed = jnp.transpose(x, (2, 0, 1, 3)).reshape(R, B * C * W).astype(jnp.bfloat16)

    # VMEM budget: rough working set, doubled for pipelining, capped at 3/4 of
    # the physical per-core VMEM of whatever generation we are on.
    bytes_est = (2 * N * N * 2            # bf16 block-diag column DFT constants
                 + 4 * R * R * 4          # row DFT constants
                 + R * N * 2              # packed x block (bf16)
                 + 3 * R * N * 4          # filter slabs
                 + N * BTW * 4            # reduction matrix
                 + 5 * R * N * 4          # stacking scratch
                 + 20 * R * N * 4         # live f32 temporaries (spectra etc.)
                 + 12 * R * BTW * 4)      # epilogue / output block
    try:
        vmem_cap = pltpu.get_tpu_info().vmem_capacity_bytes
    except Exception:   # conservative default: v7x per-core VMEM
        vmem_cap = 64 * 2**20
    vmem_limit = int(min(vmem_cap * 3 // 4, max(32 * 2**20, 2 * bytes_est)))

    kernel = functools.partial(_mono2d_kernel, r=R, bt=BT, w=W)

    def const(shape):   # constant operand: same block every grid step
        return pl.BlockSpec(shape, lambda g: (0, 0))

    out_slab = pl.pallas_call(
        kernel,
        grid=(G,),
        in_specs=[
            pl.BlockSpec((R, N), lambda g: (0, g)),   # packed x (bf16)
            const((R, N)),                            # log-Gabor slab
            const((R, N)),                            # log-Gabor * H (real)
            const((R, N)),                            # log-Gabor * H (imag)
            const((R, R)),                            # forward row DFT re
            const((R, R)),                            # forward row DFT im
            const((R, R)),                            # inverse row DFT re (scaled)
            const((R, R)),                            # inverse row DFT im (scaled)
            const((N, N)),                            # block-diag column DFT re (bf16)
            const((N, N)),                            # block-diag column DFT im (bf16)
            const((N, BTW)),                          # channel-reduction matrix
        ],
        out_specs=pl.BlockSpec((3 * R, BTW), lambda g: (0, g)),
        out_shape=jax.ShapeDtypeStruct((3 * R, B * W), jnp.float32),
        scratch_shapes=[pltpu.VMEM((5 * R, N), jnp.float32)],
        compiler_params=pltpu.CompilerParams(
            dimension_semantics=("parallel",),
            vmem_limit_bytes=vmem_limit,
        ),
    )(x_packed, lg_slab, lghre_slab, lghim_slab,
      fr_re, fr_im, fi_re, fi_im, fcbd_re, fcbd_im, mred)

    def unpack(slab):  # (R, B*W) -> (B, R, W)
        return jnp.transpose(slab.reshape(R, B, W), (1, 0, 2))

    ft = unpack(out_slab[0 * R:1 * R])
    ori = unpack(out_slab[1 * R:2 * R])
    pa = unpack(out_slab[2 * R:3 * R])

    outs = []
    if return_input:
        outs.append(x)   # same shape caveat as torch.stack in the original module
    if return_phase:
        outs.append(ft)
    if return_ori:
        outs.append(ori)
    if return_phase_asym:
        outs.append(pa)
    out = jnp.stack(outs, axis=1)
    if fuse:
        return out + x
    return out


if __name__ == "__main__":
    key = jax.random.PRNGKey(0)
    kx, kw, ks = jax.random.split(key, 3)

    nscale = 1
    # deterministic stand-ins for the module's torch.randn parameter init
    wls_raw = jax.random.normal(kw, (nscale,), dtype=jnp.float32)         # initialize_wls
    sigmaonf_raw = jax.random.normal(ks, (1,), dtype=jnp.float32) * 0.05  # initialize_sigmaonf

    x = jax.random.normal(kx, (2, 4, 16, 16), dtype=jnp.float32)          # NCHW

    out = mono2d_forward(x, wls_raw, sigmaonf_raw)   # default flags -> phase only
    out = jax.block_until_ready(out)

    assert out.shape == (2, 1, 16, 16), out.shape
    assert bool(jnp.isfinite(out).all())
    print("KERNEL_OK")
</pallas_src>

<mosaic_0001>
module attributes {stable_mosaic.version = 11 : i64} {
  func.func @_mono2d_kernel(%arg0: i32, %arg1: memref<16x128xbf16, #tpu.memory_space<vmem>>, %arg2: memref<16x128xf32, #tpu.memory_space<vmem>>, %arg3: memref<16x128xf32, #tpu.memory_space<vmem>>, %arg4: memref<16x128xf32, #tpu.memory_space<vmem>>, %arg5: memref<16x16xf32, #tpu.memory_space<vmem>>, %arg6: memref<16x16xf32, #tpu.memory_space<vmem>>, %arg7: memref<16x16xf32, #tpu.memory_space<vmem>>, %arg8: memref<16x16xf32, #tpu.memory_space<vmem>>, %arg9: memref<128x128xbf16, #tpu.memory_space<vmem>>, %arg10: memref<128x128xbf16, #tpu.memory_space<vmem>>, %arg11: memref<128x32xf32, #tpu.memory_space<vmem>>, %arg12: memref<48x32xf32, #tpu.memory_space<vmem>>, %arg13: memref<80x128xf32, #tpu.memory_space<vmem>>) attributes {dimension_semantics = [#tpu.dimension_semantics<parallel>], iteration_bounds = array<i64: 1>, scalar_prefetch = 0 : i64, scratch_operands = 1 : i64, tpu.core_type = #tpu.core_type<tc>, window_params = [{transform_indices = @transform_0, window_bounds = array<i64: 16, 128>}, {pipeline_mode = #tpu.pipeline_mode<synchronous>, transform_indices = @transform_1, window_bounds = array<i64: 16, 128>}, {pipeline_mode = #tpu.pipeline_mode<synchronous>, transform_indices = @transform_2, window_bounds = array<i64: 16, 128>}, {pipeline_mode = #tpu.pipeline_mode<synchronous>, transform_indices = @transform_3, window_bounds = array<i64: 16, 128>}, {pipeline_mode = #tpu.pipeline_mode<synchronous>, transform_indices = @transform_4, window_bounds = array<i64: 16, 16>}, {pipeline_mode = #tpu.pipeline_mode<synchronous>, transform_indices = @transform_5, window_bounds = array<i64: 16, 16>}, {pipeline_mode = #tpu.pipeline_mode<synchronous>, transform_indices = @transform_6, window_bounds = array<i64: 16, 16>}, {pipeline_mode = #tpu.pipeline_mode<synchronous>, transform_indices = @transform_7, window_bounds = array<i64: 16, 16>}, {pipeline_mode = #tpu.pipeline_mode<synchronous>, transform_indices = @transform_8, window_bounds = array<i64: 128, 128>}, {pipeline_mode = #tpu.pipeline_mode<synchronous>, transform_indices = @transform_9, window_bounds = array<i64: 128, 128>}, {pipeline_mode = #tpu.pipeline_mode<synchronous>, transform_indices = @transform_10, window_bounds = array<i64: 128, 32>}, {transform_indices = @transform_11, window_bounds = array<i64: 48, 32>}]} {
    %c0 = arith.constant 0 : index
    %c0_0 = arith.constant 0 : index
    %0 = vector.load %arg1[%c0, %c0_0] : memref<16x128xbf16, #tpu.memory_space<vmem>>, vector<16x128xbf16>
    %c0_1 = arith.constant 0 : index
    %c0_2 = arith.constant 0 : index
    %1 = vector.load %arg2[%c0_1, %c0_2] : memref<16x128xf32, #tpu.memory_space<vmem>>, vector<16x128xf32>
    %c0_3 = arith.constant 0 : index
    %c0_4 = arith.constant 0 : index
    %2 = vector.load %arg3[%c0_3, %c0_4] : memref<16x128xf32, #tpu.memory_space<vmem>>, vector<16x128xf32>
    %c0_5 = arith.constant 0 : index
    %c0_6 = arith.constant 0 : index
    %3 = vector.load %arg4[%c0_5, %c0_6] : memref<16x128xf32, #tpu.memory_space<vmem>>, vector<16x128xf32>
    %c0_7 = arith.constant 0 : index
    %c0_8 = arith.constant 0 : index
    %4 = vector.load %arg5[%c0_7, %c0_8] : memref<16x16xf32, #tpu.memory_space<vmem>>, vector<16x16xf32>
    %c0_9 = arith.constant 0 : index
    %c0_10 = arith.constant 0 : index
    %5 = vector.load %arg6[%c0_9, %c0_10] : memref<16x16xf32, #tpu.memory_space<vmem>>, vector<16x16xf32>
    %c0_11 = arith.constant 0 : index
    %c0_12 = arith.constant 0 : index
    %6 = vector.load %arg7[%c0_11, %c0_12] : memref<16x16xf32, #tpu.memory_space<vmem>>, vector<16x16xf32>
    %c0_13 = arith.constant 0 : index
    %c0_14 = arith.constant 0 : index
    %7 = vector.load %arg8[%c0_13, %c0_14] : memref<16x16xf32, #tpu.memory_space<vmem>>, vector<16x16xf32>
    %c0_15 = arith.constant 0 : index
    %c0_16 = arith.constant 0 : index
    %8 = vector.load %arg9[%c0_15, %c0_16] : memref<128x128xbf16, #tpu.memory_space<vmem>>, vector<128x128xbf16>
    %c0_17 = arith.constant 0 : index
    %c0_18 = arith.constant 0 : index
    %9 = vector.load %arg10[%c0_17, %c0_18] : memref<128x128xbf16, #tpu.memory_space<vmem>>, vector<128x128xbf16>
    %c0_19 = arith.constant 0 : index
    %c0_20 = arith.constant 0 : index
    %10 = vector.load %arg11[%c0_19, %c0_20] : memref<128x32xf32, #tpu.memory_space<vmem>>, vector<128x32xf32>
    %cst = arith.constant dense<0.000000e+00> : vector<16x128xf32>
    %11 = tpu.matmul %0, %8, %cst {dimension_numbers = #tpu.dot_dimension_numbers<[1], [0], [0], [1], [0, 0, 1, 1], [], []>} : vector<16x128xbf16>, vector<128x128xbf16>, vector<16x128xf32> -> vector<16x128xf32>
    %cst_21 = arith.constant dense<0.000000e+00> : vector<16x128xf32>
    %12 = tpu.matmul %0, %9, %cst_21 {dimension_numbers = #tpu.dot_dimension_numbers<[1], [0], [0], [1], [0, 0, 1, 1], [], []>} : vector<16x128xbf16>, vector<128x128xbf16>, vector<16x128xf32> -> vector<16x128xf32>
    %cst_22 = arith.constant dense<0.000000e+00> : vector<16x128xf32>
    %13 = tpu.matmul %4, %11, %cst_22 {dimension_numbers = #tpu.dot_dimension_numbers<[1], [0], [0], [1], [0, 0, 1, 1], [], []>} : vector<16x16xf32>, vector<16x128xf32>, vector<16x128xf32> -> vector<16x128xf32>
    %cst_23 = arith.constant dense<0.000000e+00> : vector<16x128xf32>
    %14 = tpu.matmul %5, %12, %cst_23 {dimension_numbers = #tpu.dot_dimension_numbers<[1], [0], [0], [1], [0, 0, 1, 1], [], []>} : vector<16x16xf32>, vector<16x128xf32>, vector<16x128xf32> -> vector<16x128xf32>
    %15 = arith.subf %13, %14 : vector<16x128xf32>
    %cst_24 = arith.constant dense<0.000000e+00> : vector<16x128xf32>
    %16 = tpu.matmul %4, %12, %cst_24 {dimension_numbers = #tpu.dot_dimension_numbers<[1], [0], [0], [1], [0, 0, 1, 1], [], []>} : vector<16x16xf32>, vector<16x128xf32>, vector<16x128xf32> -> vector<16x128xf32>
    %cst_25 = arith.constant dense<0.000000e+00> : vector<16x128xf32>
    %17 = tpu.matmul %5, %11, %cst_25 {dimension_numbers = #tpu.dot_dimension_numbers<[1], [0], [0], [1], [0, 0, 1, 1], [], []>} : vector<16x16xf32>, vector<16x128xf32>, vector<16x128xf32> -> vector<16x128xf32>
    %18 = arith.addf %16, %17 : vector<16x128xf32>
    %19 = arith.mulf %15, %1 : vector<16x128xf32>
    %20 = arith.mulf %18, %1 : vector<16x128xf32>
    %21 = arith.mulf %15, %2 : vector<16x128xf32>
    %22 = arith.mulf %18, %3 : vector<16x128xf32>
    %23 = arith.subf %21, %22 : vector<16x128xf32>
    %24 = arith.mulf %15, %3 : vector<16x128xf32>
    %25 = arith.mulf %18, %2 : vector<16x128xf32>
    %26 = arith.addf %24, %25 : vector<16x128xf32>
    %cst_26 = arith.constant dense<0.000000e+00> : vector<16x128xf32>
    %27 = tpu.matmul %6, %19, %cst_26 {dimension_numbers = #tpu.dot_dimension_numbers<[1], [0], [0], [1], [0, 0, 1, 1], [], []>} : vector<16x16xf32>, vector<16x128xf32>, vector<16x128xf32> -> vector<16x128xf32>
    %cst_27 = arith.constant dense<0.000000e+00> : vector<16x128xf32>
    %28 = tpu.matmul %7, %20, %cst_27 {dimension_numbers = #tpu.dot_dimension_numbers<[1], [0], [0], [1], [0, 0, 1, 1], [], []>} : vector<16x16xf32>, vector<16x128xf32>, vector<16x128xf32> -> vector<16x128xf32>
    %29 = arith.addf %27, %28 : vector<16x128xf32>
    %cst_28 = arith.constant dense<0.000000e+00> : vector<16x128xf32>
    %30 = tpu.matmul %6, %20, %cst_28 {dimension_numbers = #tpu.dot_dimension_numbers<[1], [0], [0], [1], [0, 0, 1, 1], [], []>} : vector<16x16xf32>, vector<16x128xf32>, vector<16x128xf32> -> vector<16x128xf32>
    %cst_29 = arith.constant dense<0.000000e+00> : vector<16x128xf32>
    %31 = tpu.matmul %7, %19, %cst_29 {dimension_numbers = #tpu.dot_dimension_numbers<[1], [0], [0], [1], [0, 0, 1, 1], [], []>} : vector<16x16xf32>, vector<16x128xf32>, vector<16x128xf32> -> vector<16x128xf32>
    %32 = arith.subf %30, %31 : vector<16x128xf32>
    %cst_30 = arith.constant dense<0.000000e+00> : vector<16x128xf32>
    %33 = tpu.matmul %6, %23, %cst_30 {dimension_numbers = #tpu.dot_dimension_numbers<[1], [0], [0], [1], [0, 0, 1, 1], [], []>} : vector<16x16xf32>, vector<16x128xf32>, vector<16x128xf32> -> vector<16x128xf32>
    %cst_31 = arith.constant dense<0.000000e+00> : vector<16x128xf32>
    %34 = tpu.matmul %7, %26, %cst_31 {dimension_numbers = #tpu.dot_dimension_numbers<[1], [0], [0], [1], [0, 0, 1, 1], [], []>} : vector<16x16xf32>, vector<16x128xf32>, vector<16x128xf32> -> vector<16x128xf32>
    %35 = arith.addf %33, %34 : vector<16x128xf32>
    %cst_32 = arith.constant dense<0.000000e+00> : vector<16x128xf32>
    %36 = tpu.matmul %6, %26, %cst_32 {dimension_numbers = #tpu.dot_dimension_numbers<[1], [0], [0], [1], [0, 0, 1, 1], [], []>} : vector<16x16xf32>, vector<16x128xf32>, vector<16x128xf32> -> vector<16x128xf32>
    %cst_33 = arith.constant dense<0.000000e+00> : vector<16x128xf32>
    %37 = tpu.matmul %7, %23, %cst_33 {dimension_numbers = #tpu.dot_dimension_numbers<[1], [0], [0], [1], [0, 0, 1, 1], [], []>} : vector<16x16xf32>, vector<16x128xf32>, vector<16x128xf32> -> vector<16x128xf32>
    %38 = arith.subf %36, %37 : vector<16x128xf32>
    %39 = arith.truncf %29 : vector<16x128xf32> to vector<16x128xbf16>
    %40 = arith.truncf %32 : vector<16x128xf32> to vector<16x128xbf16>
    %41 = arith.truncf %35 : vector<16x128xf32> to vector<16x128xbf16>
    %42 = arith.truncf %38 : vector<16x128xf32> to vector<16x128xbf16>
    %cst_34 = arith.constant dense<0.000000e+00> : vector<16x128xf32>
    %43 = tpu.matmul %39, %8, %cst_34 {dimension_numbers = #tpu.dot_dimension_numbers<[1], [0], [0], [1], [0, 0, 1, 1], [], []>} : vector<16x128xbf16>, vector<128x128xbf16>, vector<16x128xf32> -> vector<16x128xf32>
    %cst_35 = arith.constant dense<0.000000e+00> : vector<16x128xf32>
    %44 = tpu.matmul %40, %9, %cst_35 {dimension_numbers = #tpu.dot_dimension_numbers<[1], [0], [0], [1], [0, 0, 1, 1], [], []>} : vector<16x128xbf16>, vector<128x128xbf16>, vector<16x128xf32> -> vector<16x128xf32>
    %45 = arith.addf %43, %44 : vector<16x128xf32>
    %cst_36 = arith.constant dense<0.000000e+00> : vector<16x128xf32>
    %46 = tpu.matmul %41, %8, %cst_36 {dimension_numbers = #tpu.dot_dimension_numbers<[1], [0], [0], [1], [0, 0, 1, 1], [], []>} : vector<16x128xbf16>, vector<128x128xbf16>, vector<16x128xf32> -> vector<16x128xf32>
    %cst_37 = arith.constant dense<0.000000e+00> : vector<16x128xf32>
    %47 = tpu.matmul %42, %9, %cst_37 {dimension_numbers = #tpu.dot_dimension_numbers<[1], [0], [0], [1], [0, 0, 1, 1], [], []>} : vector<16x128xbf16>, vector<128x128xbf16>, vector<16x128xf32> -> vector<16x128xf32>
    %48 = arith.addf %46, %47 : vector<16x128xf32>
    %cst_38 = arith.constant dense<0.000000e+00> : vector<16x128xf32>
    %49 = tpu.matmul %42, %8, %cst_38 {dimension_numbers = #tpu.dot_dimension_numbers<[1], [0], [0], [1], [0, 0, 1, 1], [], []>} : vector<16x128xbf16>, vector<128x128xbf16>, vector<16x128xf32> -> vector<16x128xf32>
    %cst_39 = arith.constant dense<0.000000e+00> : vector<16x128xf32>
    %50 = tpu.matmul %41, %9, %cst_39 {dimension_numbers = #tpu.dot_dimension_numbers<[1], [0], [0], [1], [0, 0, 1, 1], [], []>} : vector<16x128xbf16>, vector<128x128xbf16>, vector<16x128xf32> -> vector<16x128xf32>
    %51 = arith.subf %49, %50 : vector<16x128xf32>
    %52 = arith.mulf %48, %48 : vector<16x128xf32>
    %53 = arith.mulf %51, %51 : vector<16x128xf32>
    %54 = arith.addf %52, %53 : vector<16x128xf32>
    %55 = arith.mulf %45, %45 : vector<16x128xf32>
    %56 = arith.addf %55, %54 : vector<16x128xf32>
    %57 = math.sqrt %56 : vector<16x128xf32>
    %58 = math.sqrt %54 : vector<16x128xf32>
    %59 = math.absf %45 : vector<16x128xf32>
    %60 = arith.subf %58, %59 : vector<16x128xf32>
    %c0_40 = arith.constant 0 : index
    %c0_41 = arith.constant 0 : index
    %61 = vector.load %arg13[%c0_40, %c0_41] : memref<80x128xf32, #tpu.memory_space<vmem>>, vector<16x128xf32>
    tpu.vector_store %arg13[%c0_40, %c0_41], %45 {strides = array<i32>} : memref<80x128xf32, #tpu.memory_space<vmem>>, vector<16x128xf32>,
    %c16 = arith.constant 16 : index
    %c0_42 = arith.constant 0 : index
    %62 = vector.load %arg13[%c16, %c0_42] : memref<80x128xf32, #tpu.memory_space<vmem>>, vector<16x128xf32>
    tpu.vector_store %arg13[%c16, %c0_42], %48 {strides = array<i32>} : memref<80x128xf32, #tpu.memory_space<vmem>>, vector<16x128xf32>,
    %c32 = arith.constant 32 : index
    %c0_43 = arith.constant 0 : index
    %63 = vector.load %arg13[%c32, %c0_43] : memref<80x128xf32, #tpu.memory_space<vmem>>, vector<16x128xf32>
    tpu.vector_store %arg13[%c32, %c0_43], %51 {strides = array<i32>} : memref<80x128xf32, #tpu.memory_space<vmem>>, vector<16x128xf32>,
    %c48 = arith.constant 48 : index
    %c0_44 = arith.constant 0 : index
    %64 = vector.load %arg13[%c48, %c0_44] : memref<80x128xf32, #tpu.memory_space<vmem>>, vector<16x128xf32>
    tpu.vector_store %arg13[%c48, %c0_44], %57 {strides = array<i32>} : memref<80x128xf32, #tpu.memory_space<vmem>>, vector<16x128xf32>,
    %c64 = arith.constant 64 : index
    %c0_45 = arith.constant 0 : index
    %65 = vector.load %arg13[%c64, %c0_45] : memref<80x128xf32, #tpu.memory_space<vmem>>, vector<16x128xf32>
    tpu.vector_store %arg13[%c64, %c0_45], %60 {strides = array<i32>} : memref<80x128xf32, #tpu.memory_space<vmem>>, vector<16x128xf32>,
    %c0_46 = arith.constant 0 : index
    %c0_47 = arith.constant 0 : index
    %66 = vector.load %arg13[%c0_46, %c0_47] : memref<80x128xf32, #tpu.memory_space<vmem>>, vector<80x128xf32>
    %cst_48 = arith.constant dense<0.000000e+00> : vector<80x32xf32>
    %67 = tpu.matmul %66, %10, %cst_48 {dimension_numbers = #tpu.dot_dimension_numbers<[1], [0], [0], [1], [0, 0, 1, 1], [], []>} : vector<80x128xf32>, vector<128x32xf32>, vector<80x32xf32> -> vector<80x32xf32>
    %68 = vector.extract_strided_slice %67 {offsets = [0, 0], sizes = [16, 32], strides = [1, 1]} : vector<80x32xf32> to vector<16x32xf32>
    %69 = vector.extract_strided_slice %67 {offsets = [16, 0], sizes = [16, 32], strides = [1, 1]} : vector<80x32xf32> to vector<16x32xf32>
    %70 = vector.extract_strided_slice %67 {offsets = [32, 0], sizes = [16, 32], strides = [1, 1]} : vector<80x32xf32> to vector<16x32xf32>
    %71 = vector.extract_strided_slice %67 {offsets = [48, 0], sizes = [16, 32], strides = [1, 1]} : vector<80x32xf32> to vector<16x32xf32>
    %72 = vector.extract_strided_slice %67 {offsets = [64, 0], sizes = [16, 32], strides = [1, 1]} : vector<80x32xf32> to vector<16x32xf32>
    %cst_49 = arith.constant 0.000000e+00 : f32
    %73 = vector.broadcast %cst_49 : f32 to vector<16x32xf32>
    %74 = arith.subf %72, %73 : vector<16x32xf32>
    %cst_50 = arith.constant 0.000000e+00 : f32
    %75 = vector.broadcast %cst_50 : f32 to vector<16x32xf32>
    %76 = arith.maximumf %74, %75 : vector<16x32xf32>
    %cst_51 = arith.constant 9.99999974E-5 : f32
    %77 = vector.broadcast %cst_51 : f32 to vector<16x32xf32>
    %78 = arith.addf %71, %77 : vector<16x32xf32>
    %79 = tpu.reciprocal %78 : vector<16x32xf32> -> vector<16x32xf32>
    %80 = arith.mulf %76, %79 : vector<16x32xf32>
    %cst_52 = arith.constant 0.000000e+00 : f32
    %81 = vector.broadcast %cst_52 : f32 to vector<16x32xf32>
    %82 = arith.subf %81, %70 : vector<16x32xf32>
    %cst_53 = arith.constant 0.000000e+00 : f32
    %83 = vector.broadcast %cst_53 : f32 to vector<16x32xf32>
    %84 = arith.cmpf oeq, %69, %83 : vector<16x32xf32>
    %cst_54 = arith.constant 1.000000e+00 : f32
    %85 = vector.broadcast %cst_54 : f32 to vector<16x32xf32>
    %86 = arith.select %84, %85, %69 : vector<16x32xi1>, vector<16x32xf32>
    %87 = arith.divf %82, %86 : vector<16x32xf32>
    %88 = math.absf %87 : vector<16x32xf32>
    %cst_55 = arith.constant 2.41421366 : f32
    %89 = vector.broadcast %cst_55 : f32 to vector<16x32xf32>
    %90 = arith.cmpf ogt, %88, %89 : vector<16x32xf32>
    %cst_56 = arith.constant 0.414213568 : f32
    %91 = vector.broadcast %cst_56 : f32 to vector<16x32xf32>
    %92 = arith.cmpf ogt, %88, %91 : vector<16x32xf32>
    %cst_57 = arith.constant dense<true> : vector<16x32xi1>
    %93 = arith.xori %90, %cst_57 : vector<16x32xi1>
    %94 = arith.andi %92, %93 : vector<16x32xi1>
    %cst_58 = arith.constant 1.000000e+00 : f32
    %95 = vector.broadcast %cst_58 : f32 to vector<16x32xf32>
    %96 = arith.select %90, %88, %95 : vector<16x32xi1>, vector<16x32xf32>
    %cst_59 = arith.constant -1.000000e+00 : f32
    %97 = vector.broadcast %cst_59 : f32 to vector<16x32xf32>
    %98 = arith.divf %97, %96 : vector<16x32xf32>
    %cst_60 = arith.constant 1.000000e+00 : f32
    %99 = vector.broadcast %cst_60 : f32 to vector<16x32xf32>
    %100 = arith.subf %88, %99 : vector<16x32xf32>
    %cst_61 = arith.constant 1.000000e+00 : f32
    %101 = vector.broadcast %cst_61 : f32 to vector<16x32xf32>
    %102 = arith.addf %88, %101 : vector<16x32xf32>
    %103 = arith.divf %100, %102 : vector<16x32xf32>
    %104 = arith.select %94, %103, %88 : vector<16x32xi1>, vector<16x32xf32>
    %105 = arith.select %90, %98, %104 : vector<16x32xi1>, vector<16x32xf32>
    %cst_62 = arith.constant 0.785398185 : f32
    %cst_63 = arith.constant 0.000000e+00 : f32
    %106 = vector.broadcast %cst_62 : f32 to vector<16x32xf32>
    %107 = vector.broadcast %cst_63 : f32 to vector<16x32xf32>
    %108 = arith.select %94, %106, %107 : vector<16x32xi1>, vector<16x32xf32>
    %cst_64 = arith.constant 1.57079637 : f32
    %109 = vector.broadcast %cst_64 : f32 to vector<16x32xf32>
    %110 = arith.select %90, %109, %108 : vector<16x32xi1>, vector<16x32xf32>
    %111 = arith.mulf %105, %105 : vector<16x32xf32>
    %cst_65 = arith.constant 0.0805374458 : f32
    %112 = vector.broadcast %cst_65 : f32 to vector<16x32xf32>
    %113 = arith.mulf %112, %111 : vector<16x32xf32>
    %cst_66 = arith.constant 0.138776854 : f32
    %114 = vector.broadcast %cst_66 : f32 to vector<16x32xf32>
    %115 = arith.subf %113, %114 : vector<16x32xf32>
    %116 = arith.mulf %115, %111 : vector<16x32xf32>
    %cst_67 = arith.constant 0.199777111 : f32
    %117 = vector.broadcast %cst_67 : f32 to vector<16x32xf32>
    %118 = arith.addf %116, %117 : vector<16x32xf32>
    %119 = arith.mulf %118, %111 : vector<16x32xf32>
    %cst_68 = arith.constant 0.333329499 : f32
    %120 = vector.broadcast %cst_68 : f32 to vector<16x32xf32>
    %121 = arith.subf %119, %120 : vector<16x32xf32>
    %122 = arith.mulf %121, %111 : vector<16x32xf32>
    %123 = arith.mulf %122, %105 : vector<16x32xf32>
    %124 = arith.addf %123, %105 : vector<16x32xf32>
    %125 = arith.addf %110, %124 : vector<16x32xf32>
    %cst_69 = arith.constant 0.000000e+00 : f32
    %126 = vector.broadcast %cst_69 : f32 to vector<16x32xf32>
    %127 = arith.cmpf olt, %87, %126 : vector<16x32xf32>
    %cst_70 = arith.constant 0.000000e+00 : f32
    %128 = vector.broadcast %cst_70 : f32 to vector<16x32xf32>
    %129 = arith.subf %128, %125 : vector<16x32xf32>
    %130 = arith.select %127, %129, %125 : vector<16x32xi1>, vector<16x32xf32>
    %cst_71 = arith.constant 0.000000e+00 : f32
    %131 = vector.broadcast %cst_71 : f32 to vector<16x32xf32>
    %132 = arith.cmpf olt, %69, %131 : vector<16x32xf32>
    %cst_72 = arith.constant 0.000000e+00 : f32
    %133 = vector.broadcast %cst_72 : f32 to vector<16x32xf32>
    %134 = arith.cmpf oge, %82, %133 : vector<16x32xf32>
    %cst_73 = arith.constant 3.14159274 : f32
    %135 = vector.broadcast %cst_73 : f32 to vector<16x32xf32>
    %136 = arith.addf %130, %135 : vector<16x32xf32>
    %cst_74 = arith.constant 3.14159274 : f32
    %137 = vector.broadcast %cst_74 : f32 to vector<16x32xf32>
    %138 = arith.subf %130, %137 : vector<16x32xf32>
    %139 = arith.select %134, %136, %138 : vector<16x32xi1>, vector<16x32xf32>
    %140 = arith.select %132, %139, %130 : vector<16x32xi1>, vector<16x32xf32>
    %cst_75 = arith.constant 0.000000e+00 : f32
    %141 = vector.broadcast %cst_75 : f32 to vector<16x32xf32>
    %142 = arith.cmpf oeq, %69, %141 : vector<16x32xf32>
    %cst_76 = arith.constant 0.000000e+00 : f32
    %143 = vector.broadcast %cst_76 : f32 to vector<16x32xf32>
    %144 = arith.cmpf ogt, %82, %143 : vector<16x32xf32>
    %cst_77 = arith.constant 0.000000e+00 : f32
    %145 = vector.broadcast %cst_77 : f32 to vector<16x32xf32>
    %146 = arith.cmpf olt, %82, %145 : vector<16x32xf32>
    %cst_78 = arith.constant -1.57079637 : f32
    %cst_79 = arith.constant 0.000000e+00 : f32
    %147 = vector.broadcast %cst_78 : f32 to vector<16x32xf32>
    %148 = vector.broadcast %cst_79 : f32 to vector<16x32xf32>
    %149 = arith.select %146, %147, %148 : vector<16x32xi1>, vector<16x32xf32>
    %cst_80 = arith.constant 1.57079637 : f32
    %150 = vector.broadcast %cst_80 : f32 to vector<16x32xf32>
    %151 = arith.select %144, %150, %149 : vector<16x32xi1>, vector<16x32xf32>
    %152 = arith.select %142, %151, %140 : vector<16x32xi1>, vector<16x32xf32>
    %153 = arith.mulf %69, %69 : vector<16x32xf32>
    %154 = arith.mulf %70, %70 : vector<16x32xf32>
    %155 = arith.addf %153, %154 : vector<16x32xf32>
    %cst_81 = arith.constant 1.000000e-30 : f32
    %156 = vector.broadcast %cst_81 : f32 to vector<16x32xf32>
    %157 = arith.addf %155, %156 : vector<16x32xf32>
    %158 = math.rsqrt %157 : vector<16x32xf32>
    %159 = arith.mulf %68, %158 : vector<16x32xf32>
    %160 = math.absf %159 : vector<16x32xf32>
    %cst_82 = arith.constant 2.41421366 : f32
    %161 = vector.broadcast %cst_82 : f32 to vector<16x32xf32>
    %162 = arith.cmpf ogt, %160, %161 : vector<16x32xf32>
    %cst_83 = arith.constant 0.414213568 : f32
    %163 = vector.broadcast %cst_83 : f32 to vector<16x32xf32>
    %164 = arith.cmpf ogt, %160, %163 : vector<16x32xf32>
    %cst_84 = arith.constant dense<true> : vector<16x32xi1>
    %165 = arith.xori %162, %cst_84 : vector<16x32xi1>
    %166 = arith.andi %164, %165 : vector<16x32xi1>
    %cst_85 = arith.constant 1.000000e+00 : f32
    %167 = vector.broadcast %cst_85 : f32 to vector<16x32xf32>
    %168 = arith.select %162, %160, %167 : vector<16x32xi1>, vector<16x32xf32>
    %cst_86 = arith.constant -1.000000e+00 : f32
    %169 = vector.broadcast %cst_86 : f32 to vector<16x32xf32>
    %170 = arith.divf %169, %168 : vector<16x32xf32>
    %cst_87 = arith.constant 1.000000e+00 : f32
    %171 = vector.broadcast %cst_87 : f32 to vector<16x32xf32>
    %172 = arith.subf %160, %171 : vector<16x32xf32>
    %cst_88 = arith.constant 1.000000e+00 : f32
    %173 = vector.broadcast %cst_88 : f32 to vector<16x32xf32>
    %174 = arith.addf %160, %173 : vector<16x32xf32>
    %175 = arith.divf %172, %174 : vector<16x32xf32>
    %176 = arith.select %166, %175, %160 : vector<16x32xi1>, vector<16x32xf32>
    %177 = arith.select %162, %170, %176 : vector<16x32xi1>, vector<16x32xf32>
    %cst_89 = arith.constant 0.785398185 : f32
    %cst_90 = arith.constant 0.000000e+00 : f32
    %178 = vector.broadcast %cst_89 : f32 to vector<16x32xf32>
    %179 = vector.broadcast %cst_90 : f32 to vector<16x32xf32>
    %180 = arith.select %166, %178, %179 : vector<16x32xi1>, vector<16x32xf32>
    %cst_91 = arith.constant 1.57079637 : f32
    %181 = vector.broadcast %cst_91 : f32 to vector<16x32xf32>
    %182 = arith.select %162, %181, %180 : vector<16x32xi1>, vector<16x32xf32>
    %183 = arith.mulf %177, %177 : vector<16x32xf32>
    %cst_92 = arith.constant 0.0805374458 : f32
    %184 = vector.broadcast %cst_92 : f32 to vector<16x32xf32>
    %185 = arith.mulf %184, %183 : vector<16x32xf32>
    %cst_93 = arith.constant 0.138776854 : f32
    %186 = vector.broadcast %cst_93 : f32 to vector<16x32xf32>
    %187 = arith.subf %185, %186 : vector<16x32xf32>
    %188 = arith.mulf %187, %183 : vector<16x32xf32>
    %cst_94 = arith.constant 0.199777111 : f32
    %189 = vector.broadcast %cst_94 : f32 to vector<16x32xf32>
    %190 = arith.addf %188, %189 : vector<16x32xf32>
    %191 = arith.mulf %190, %183 : vector<16x32xf32>
    %cst_95 = arith.constant 0.333329499 : f32
    %192 = vector.broadcast %cst_95 : f32 to vector<16x32xf32>
    %193 = arith.subf %191, %192 : vector<16x32xf32>
    %194 = arith.mulf %193, %183 : vector<16x32xf32>
    %195 = arith.mulf %194, %177 : vector<16x32xf32>
    %196 = arith.addf %195, %177 : vector<16x32xf32>
    %197 = arith.addf %182, %196 : vector<16x32xf32>
    %cst_96 = arith.constant 0.000000e+00 : f32
    %198 = vector.broadcast %cst_96 : f32 to vector<16x32xf32>
    %199 = arith.cmpf olt, %159, %198 : vector<16x32xf32>
    %cst_97 = arith.constant 0.000000e+00 : f32
    %200 = vector.broadcast %cst_97 : f32 to vector<16x32xf32>
    %201 = arith.subf %200, %197 : vector<16x32xf32>
    %202 = arith.select %199, %201, %197 : vector<16x32xi1>, vector<16x32xf32>
    %203 = tpu.iota {dimensions = array<i32: 1>} : vector<16x32xi32>
    %cst_98 = arith.constant 0.000000e+00 : f32
    %204 = vector.broadcast %cst_98 : f32 to vector<16x32xf32>
    %c0_i32 = arith.constant 0 : i32
    %205 = vector.broadcast %c0_i32 : i32 to vector<16x32xi32>
    %206 = arith.cmpi sge, %203, %205 : vector<16x32xi32>
    %c16_i32 = arith.constant 16 : i32
    %207 = vector.broadcast %c16_i32 : i32 to vector<16x32xi32>
    %208 = arith.cmpi slt, %203, %207 : vector<16x32xi32>
    %209 = arith.andi %206, %208 : vector<16x32xi1>
    %cst_99 = arith.constant -3.000000e+38 : f32
    %210 = vector.broadcast %cst_99 : f32 to vector<16x32xf32>
    %211 = arith.select %209, %202, %210 : vector<16x32xi1>, vector<16x32xf32>
    %cst_100 = arith.constant 3.000000e+38 : f32
    %212 = vector.broadcast %cst_100 : f32 to vector<16x32xf32>
    %213 = arith.select %209, %202, %212 : vector<16x32xi1>, vector<16x32xf32>
    %cst_101 = arith.constant dense<0xFF800000> : vector<16xf32>
    %214 = vector.multi_reduction <maximumf>, %211, %cst_101 [1] : vector<16x32xf32> to vector<16xf32>
    %215 = vector.shape_cast %214 : vector<16xf32> to vector<16x1xf32>
    %cst_102 = arith.constant dense<0xFF800000> : vector<1xf32>
    %216 = vector.multi_reduction <maximumf>, %215, %cst_102 [0] : vector<16x1xf32> to vector<1xf32>
    %217 = vector.shape_cast %216 : vector<1xf32> to vector<1x1xf32>
    %cst_103 = arith.constant dense<0x7F800000> : vector<16xf32>
    %218 = vector.multi_reduction <minimumf>, %213, %cst_103 [1] : vector<16x32xf32> to vector<16xf32>
    %219 = vector.shape_cast %218 : vector<16xf32> to vector<16x1xf32>
    %cst_104 = arith.constant dense<0x7F800000> : vector<1xf32>
    %220 = vector.multi_reduction <minimumf>, %219, %cst_104 [0] : vector<16x1xf32> to vector<1xf32>
    %221 = vector.shape_cast %220 : vector<1xf32> to vector<1x1xf32>
    %222 = arith.subf %217, %221 : vector<1x1xf32>
    %cst_105 = arith.constant 0.000000e+00 : f32
    %223 = vector.broadcast %cst_105 : f32 to vector<1x1xf32>
    %224 = arith.cmpf oeq, %222, %223 : vector<1x1xf32>
    %cst_106 = arith.constant 1.000000e+00 : f32
    %225 = vector.broadcast %cst_106 : f32 to vector<1x1xf32>
    %226 = arith.select %224, %225, %222 : vector<1x1xi1>, vector<1x1xf32>
    %227 = tpu.reciprocal %226 : vector<1x1xf32> -> vector<1x1xf32>
    %228 = vector.broadcast %221 : vector<1x1xf32> to vector<16x32xf32>
    %229 = arith.subf %202, %228 : vector<16x32xf32>
    %230 = vector.broadcast %227 : vector<1x1xf32> to vector<16x32xf32>
    %231 = arith.mulf %229, %230 : vector<16x32xf32>
    %cst_107 = arith.constant 0.000000e+00 : f32
    %232 = vector.broadcast %cst_107 : f32 to vector<16x32xf32>
    %233 = arith.select %209, %231, %232 : vector<16x32xi1>, vector<16x32xf32>
    %234 = arith.addf %204, %233 : vector<16x32xf32>
    %c16_i32_108 = arith.constant 16 : i32
    %235 = vector.broadcast %c16_i32_108 : i32 to vector<16x32xi32>
    %236 = arith.cmpi sge, %203, %235 : vector<16x32xi32>
    %c32_i32 = arith.constant 32 : i32
    %237 = vector.broadcast %c32_i32 : i32 to vector<16x32xi32>
    %238 = arith.cmpi slt, %203, %237 : vector<16x32xi32>
    %239 = arith.andi %236, %238 : vector<16x32xi1>
    %cst_109 = arith.constant -3.000000e+38 : f32
    %240 = vector.broadcast %cst_109 : f32 to vector<16x32xf32>
    %241 = arith.select %239, %202, %240 : vector<16x32xi1>, vector<16x32xf32>
    %cst_110 = arith.constant 3.000000e+38 : f32
    %242 = vector.broadcast %cst_110 : f32 to vector<16x32xf32>
    %243 = arith.select %239, %202, %242 : vector<16x32xi1>, vector<16x32xf32>
    %cst_111 = arith.constant dense<0xFF800000> : vector<16xf32>
    %244 = vector.multi_reduction <maximumf>, %241, %cst_111 [1] : vector<16x32xf32> to vector<16xf32>
    %245 = vector.shape_cast %244 : vector<16xf32> to vector<16x1xf32>
    %cst_112 = arith.constant dense<0xFF800000> : vector<1xf32>
    %246 = vector.multi_reduction <maximumf>, %245, %cst_112 [0] : vector<16x1xf32> to vector<1xf32>
    %247 = vector.shape_cast %246 : vector<1xf32> to vector<1x1xf32>
    %cst_113 = arith.constant dense<0x7F800000> : vector<16xf32>
    %248 = vector.multi_reduction <minimumf>, %243, %cst_113 [1] : vector<16x32xf32> to vector<16xf32>
    %249 = vector.shape_cast %248 : vector<16xf32> to vector<16x1xf32>
    %cst_114 = arith.constant dense<0x7F800000> : vector<1xf32>
    %250 = vector.multi_reduction <minimumf>, %249, %cst_114 [0] : vector<16x1xf32> to vector<1xf32>
    %251 = vector.shape_cast %250 : vector<1xf32> to vector<1x1xf32>
    %252 = arith.subf %247, %251 : vector<1x1xf32>
    %cst_115 = arith.constant 0.000000e+00 : f32
    %253 = vector.broadcast %cst_115 : f32 to vector<1x1xf32>
    %254 = arith.cmpf oeq, %252, %253 : vector<1x1xf32>
    %cst_116 = arith.constant 1.000000e+00 : f32
    %255 = vector.broadcast %cst_116 : f32 to vector<1x1xf32>
    %256 = arith.select %254, %255, %252 : vector<1x1xi1>, vector<1x1xf32>
    %257 = tpu.reciprocal %256 : vector<1x1xf32> -> vector<1x1xf32>
    %258 = vector.broadcast %251 : vector<1x1xf32> to vector<16x32xf32>
    %259 = arith.subf %202, %258 : vector<16x32xf32>
    %260 = vector.broadcast %257 : vector<1x1xf32> to vector<16x32xf32>
    %261 = arith.mulf %259, %260 : vector<16x32xf32>
    %cst_117 = arith.constant 0.000000e+00 : f32
    %262 = vector.broadcast %cst_117 : f32 to vector<16x32xf32>
    %263 = arith.select %239, %261, %262 : vector<16x32xi1>, vector<16x32xf32>
    %264 = arith.addf %234, %263 : vector<16x32xf32>
    %c0_118 = arith.constant 0 : index
    %c0_119 = arith.constant 0 : index
    %265 = vector.load %arg12[%c0_118, %c0_119] : memref<48x32xf32, #tpu.memory_space<vmem>>, vector<16x32xf32>
    tpu.vector_store %arg12[%c0_118, %c0_119], %264 {strides = array<i32>} : memref<48x32xf32, #tpu.memory_space<vmem>>, vector<16x32xf32>,
    %cst_120 = arith.constant 0.000000e+00 : f32
    %266 = vector.broadcast %cst_120 : f32 to vector<16x32xf32>
    %c0_i32_121 = arith.constant 0 : i32
    %267 = vector.broadcast %c0_i32_121 : i32 to vector<16x32xi32>
    %268 = arith.cmpi sge, %203, %267 : vector<16x32xi32>
    %c16_i32_122 = arith.constant 16 : i32
    %269 = vector.broadcast %c16_i32_122 : i32 to vector<16x32xi32>
    %270 = arith.cmpi slt, %203, %269 : vector<16x32xi32>
    %271 = arith.andi %268, %270 : vector<16x32xi1>
    %cst_123 = arith.constant -3.000000e+38 : f32
    %272 = vector.broadcast %cst_123 : f32 to vector<16x32xf32>
    %273 = arith.select %271, %152, %272 : vector<16x32xi1>, vector<16x32xf32>
    %cst_124 = arith.constant 3.000000e+38 : f32
    %274 = vector.broadcast %cst_124 : f32 to vector<16x32xf32>
    %275 = arith.select %271, %152, %274 : vector<16x32xi1>, vector<16x32xf32>
    %cst_125 = arith.constant dense<0xFF800000> : vector<16xf32>
    %276 = vector.multi_reduction <maximumf>, %273, %cst_125 [1] : vector<16x32xf32> to vector<16xf32>
    %277 = vector.shape_cast %276 : vector<16xf32> to vector<16x1xf32>
    %cst_126 = arith.constant dense<0xFF800000> : vector<1xf32>
    %278 = vector.multi_reduction <maximumf>, %277, %cst_126 [0] : vector<16x1xf32> to vector<1xf32>
    %279 = vector.shape_cast %278 : vector<1xf32> to vector<1x1xf32>
    %cst_127 = arith.constant dense<0x7F800000> : vector<16xf32>
    %280 = vector.multi_reduction <minimumf>, %275, %cst_127 [1] : vector<16x32xf32> to vector<16xf32>
    %281 = vector.shape_cast %280 : vector<16xf32> to vector<16x1xf32>
    %cst_128 = arith.constant dense<0x7F800000> : vector<1xf32>
    %282 = vector.multi_reduction <minimumf>, %281, %cst_128 [0] : vector<16x1xf32> to vector<1xf32>
    %283 = vector.shape_cast %282 : vector<1xf32> to vector<1x1xf32>
    %284 = arith.subf %279, %283 : vector<1x1xf32>
    %cst_129 = arith.constant 0.000000e+00 : f32
    %285 = vector.broadcast %cst_129 : f32 to vector<1x1xf32>
    %286 = arith.cmpf oeq, %284, %285 : vector<1x1xf32>
    %cst_130 = arith.constant 1.000000e+00 : f32
    %287 = vector.broadcast %cst_130 : f32 to vector<1x1xf32>
    %288 = arith.select %286, %287, %284 : vector<1x1xi1>, vector<1x1xf32>
    %289 = tpu.reciprocal %288 : vector<1x1xf32> -> vector<1x1xf32>
    %290 = vector.broadcast %283 : vector<1x1xf32> to vector<16x32xf32>
    %291 = arith.subf %152, %290 : vector<16x32xf32>
    %292 = vector.broadcast %289 : vector<1x1xf32> to vector<16x32xf32>
    %293 = arith.mulf %291, %292 : vector<16x32xf32>
    %cst_131 = arith.constant 0.000000e+00 : f32
    %294 = vector.broadcast %cst_131 : f32 to vector<16x32xf32>
    %295 = arith.select %271, %293, %294 : vector<16x32xi1>, vector<16x32xf32>
    %296 = arith.addf %266, %295 : vector<16x32xf32>
    %c16_i32_132 = arith.constant 16 : i32
    %297 = vector.broadcast %c16_i32_132 : i32 to vector<16x32xi32>
    %298 = arith.cmpi sge, %203, %297 : vector<16x32xi32>
    %c32_i32_133 = arith.constant 32 : i32
    %299 = vector.broadcast %c32_i32_133 : i32 to vector<16x32xi32>
    %300 = arith.cmpi slt, %203, %299 : vector<16x32xi32>
    %301 = arith.andi %298, %300 : vector<16x32xi1>
    %cst_134 = arith.constant -3.000000e+38 : f32
    %302 = vector.broadcast %cst_134 : f32 to vector<16x32xf32>
    %303 = arith.select %301, %152, %302 : vector<16x32xi1>, vector<16x32xf32>
    %cst_135 = arith.constant 3.000000e+38 : f32
    %304 = vector.broadcast %cst_135 : f32 to vector<16x32xf32>
    %305 = arith.select %301, %152, %304 : vector<16x32xi1>, vector<16x32xf32>
    %cst_136 = arith.constant dense<0xFF800000> : vector<16xf32>
    %306 = vector.multi_reduction <maximumf>, %303, %cst_136 [1] : vector<16x32xf32> to vector<16xf32>
    %307 = vector.shape_cast %306 : vector<16xf32> to vector<16x1xf32>
    %cst_137 = arith.constant dense<0xFF800000> : vector<1xf32>
    %308 = vector.multi_reduction <maximumf>, %307, %cst_137 [0] : vector<16x1xf32> to vector<1xf32>
    %309 = vector.shape_cast %308 : vector<1xf32> to vector<1x1xf32>
    %cst_138 = arith.constant dense<0x7F800000> : vector<16xf32>
    %310 = vector.multi_reduction <minimumf>, %305, %cst_138 [1] : vector<16x32xf32> to vector<16xf32>
    %311 = vector.shape_cast %310 : vector<16xf32> to vector<16x1xf32>
    %cst_139 = arith.constant dense<0x7F800000> : vector<1xf32>
    %312 = vector.multi_reduction <minimumf>, %311, %cst_139 [0] : vector<16x1xf32> to vector<1xf32>
    %313 = vector.shape_cast %312 : vector<1xf32> to vector<1x1xf32>
    %314 = arith.subf %309, %313 : vector<1x1xf32>
    %cst_140 = arith.constant 0.000000e+00 : f32
    %315 = vector.broadcast %cst_140 : f32 to vector<1x1xf32>
    %316 = arith.cmpf oeq, %314, %315 : vector<1x1xf32>
    %cst_141 = arith.constant 1.000000e+00 : f32
    %317 = vector.broadcast %cst_141 : f32 to vector<1x1xf32>
    %318 = arith.select %316, %317, %314 : vector<1x1xi1>, vector<1x1xf32>
    %319 = tpu.reciprocal %318 : vector<1x1xf32> -> vector<1x1xf32>
    %320 = vector.broadcast %313 : vector<1x1xf32> to vector<16x32xf32>
    %321 = arith.subf %152, %320 : vector<16x32xf32>
    %322 = vector.broadcast %319 : vector<1x1xf32> to vector<16x32xf32>
    %323 = arith.mulf %321, %322 : vector<16x32xf32>
    %cst_142 = arith.constant 0.000000e+00 : f32
    %324 = vector.broadcast %cst_142 : f32 to vector<16x32xf32>
    %325 = arith.select %301, %323, %324 : vector<16x32xi1>, vector<16x32xf32>
    %326 = arith.addf %296, %325 : vector<16x32xf32>
    %c16_143 = arith.constant 16 : index
    %c0_144 = arith.constant 0 : index
    %327 = vector.load %arg12[%c16_143, %c0_144] : memref<48x32xf32, #tpu.memory_space<vmem>>, vector<16x32xf32>
    tpu.vector_store %arg12[%c16_143, %c0_144], %326 {strides = array<i32>} : memref<48x32xf32, #tpu.memory_space<vmem>>, vector<16x32xf32>,
    %c32_145 = arith.constant 32 : index
    %c0_146 = arith.constant 0 : index
    %328 = vector.load %arg12[%c32_145, %c0_146] : memref<48x32xf32, #tpu.memory_space<vmem>>, vector<16x32xf32>
    tpu.vector_store %arg12[%c32_145, %c0_146], %80 {strides = array<i32>} : memref<48x32xf32, #tpu.memory_space<vmem>>, vector<16x32xf32>,
    return
  }
  func.func @transform_0(%arg0: i32) -> (i32, i32) {
    %c0_i32 = arith.constant 0 : i32
    %c0_i32_0 = arith.constant 0 : i32
    return %c0_i32, %arg0 : i32, i32
  }
  func.func @transform_1(%arg0: i32) -> (i32, i32) {
    %c0_i32 = arith.constant 0 : i32
    %c0_i32_0 = arith.constant 0 : i32
    %c0_i32_1 = arith.constant 0 : i32
    return %c0_i32, %c0_i32_0 : i32, i32
  }
  func.func @transform_2(%arg0: i32) -> (i32, i32) {
    %c0_i32 = arith.constant 0 : i32
    %c0_i32_0 = arith.constant 0 : i32
    %c0_i32_1 = arith.constant 0 : i32
    return %c0_i32, %c0_i32_0 : i32, i32
  }
  func.func @transform_3(%arg0: i32) -> (i32, i32) {
    %c0_i32 = arith.constant 0 : i32
    %c0_i32_0 = arith.constant 0 : i32
    %c0_i32_1 = arith.constant 0 : i32
    return %c0_i32, %c0_i32_0 : i32, i32
  }
  func.func @transform_4(%arg0: i32) -> (i32, i32) {
    %c0_i32 = arith.constant 0 : i32
    %c0_i32_0 = arith.constant 0 : i32
    %c0_i32_1 = arith.constant 0 : i32
    return %c0_i32, %c0_i32_0 : i32, i32
  }
  func.func @transform_5(%arg0: i32) -> (i32, i32) {
    %c0_i32 = arith.constant 0 : i32
    %c0_i32_0 = arith.constant 0 : i32
    %c0_i32_1 = arith.constant 0 : i32
    return %c0_i32, %c0_i32_0 : i32, i32
  }
  func.func @transform_6(%arg0: i32) -> (i32, i32) {
    %c0_i32 = arith.constant 0 : i32
    %c0_i32_0 = arith.constant 0 : i32
    %c0_i32_1 = arith.constant 0 : i32
    return %c0_i32, %c0_i32_0 : i32, i32
  }
  func.func @transform_7(%arg0: i32) -> (i32, i32) {
    %c0_i32 = arith.constant 0 : i32
    %c0_i32_0 = arith.constant 0 : i32
    %c0_i32_1 = arith.constant 0 : i32
    return %c0_i32, %c0_i32_0 : i32, i32
  }
  func.func @transform_8(%arg0: i32) -> (i32, i32) {
    %c0_i32 = arith.constant 0 : i32
    %c0_i32_0 = arith.constant 0 : i32
    %c0_i32_1 = arith.constant 0 : i32
    return %c0_i32, %c0_i32_0 : i32, i32
  }
  func.func @transform_9(%arg0: i32) -> (i32, i32) {
    %c0_i32 = arith.constant 0 : i32
    %c0_i32_0 = arith.constant 0 : i32
    %c0_i32_1 = arith.constant 0 : i32
    return %c0_i32, %c0_i32_0 : i32, i32
  }
  func.func @transform_10(%arg0: i32) -> (i32, i32) {
    %c0_i32 = arith.constant 0 : i32
    %c0_i32_0 = arith.constant 0 : i32
    %c0_i32_1 = arith.constant 0 : i32
    return %c0_i32, %c0_i32_0 : i32, i32
  }
  func.func @transform_11(%arg0: i32) -> (i32, i32) {
    %c0_i32 = arith.constant 0 : i32
    %c0_i32_0 = arith.constant 0 : i32
    return %c0_i32, %arg0 : i32, i32
  }
}

</mosaic_0001>

<bundles_post_ra>
// kernel: tpu_custom_call.1
= control target key start
LH: loop header
LB: loop body
LE: loop exit
PB: predicated region body
PF: predicated region fallthrough
CT: control target
= control target key end

     0   :  { %16 = vsyncpa [#allocation4], 0  ;;  %s2721_s0 = inlined_call_operand.hbm [shape: bf16[16,128], index: 0, kind: input, shape index: {}]   ;;  %s2722_s1 = inlined_call_operand.vmem [shape: f32[16,128], index: 1, kind: input, shape index: {}]   ;;  %s2723_s2 = inlined_call_operand.vmem [shape: f32[16,128], index: 2, kind: input, shape index: {}]   ;;  %s2724_s3 = inlined_call_operand.hbm [shape: f32[16,128], index: 3, kind: input, shape index: {}]   ;;  %s2725_s4 = inlined_call_operand.hbm [shape: f32[16,16], index: 4, kind: input, shape index: {}]   ;;  %s2726_s5 = inlined_call_operand.hbm [shape: f32[16,16], index: 5, kind: input, shape index: {}]   ;;  %s2727_s6 = inlined_call_operand.hbm [shape: f32[16,16], index: 6, kind: input, shape index: {}]   ;;  %s2728_s7 = inlined_call_operand.hbm [shape: f32[16,16], index: 7, kind: input, shape index: {}]   ;;  %s2729_s8 = inlined_call_operand.vmem [shape: bf16[128,128], index: 8, kind: input, shape index: {}]   ;;  %s2730_s9 = inlined_call_operand.vmem [shape: bf16[128,128], index: 9, kind: input, shape index: {}]   ;;  %s2731_s10 = inlined_call_operand.vmem [shape: f32[128,32], index: 10, kind: input, shape index: {}]   ;;  %s2732_s11 = inlined_call_operand.vmem [shape: f32[48,32], index: 11, kind: output, shape index: {}]  }
   0x1   :  { %17 = vsyncpa [#allocation6], 0 }
   0x2   :  { %18 = vsyncpa [#allocation9], 0  ;;  %s41_s19 = sshll.u32 %s2724_s3, 4  ;;  %s42_s19 = int_to_ptr.hbm [resolvable:$true] %s41_s19 }
   0x3   :  { %19 = vsyncpa [#allocation12], 0  ;;  %s1788_s20 = smov [#allocation5]   ;;  %s67_s24 = sshll.u32 %s2726_s5, 4  ;;  %s68_s24 = int_to_ptr.hbm [resolvable:$true] %s67_s24 }
   0x4   :  { %s43_s21 = sshll.u32 %s1788_s20, 4  ;;  %s1789_s25 = smov 128   ;;  %s44_s21 = int_to_ptr.vmem [resolvable:$true] %s43_s21 }
   0x5   :  { %s1790_s26 = smov 8   ;;  %s1791_s27 = smov [#allocation8]  }
   0x6   :  { %49 = dma.hbm_to_vmem [thread:$0]  %s42_s19, 256, %s44_s21, [#allocation6], %s1789_s25, %s1789_s25, %s1790_s26  }
   0x7   :  { %s69_s28 = sshll.u32 %s1791_s27, 4  ;;  %s24_s30 = sshll.u32 %s2721_s0, 4  ;;  %s70_s28 = int_to_ptr.vmem [resolvable:$true] %s69_s28  ;;  %s25_s30 = int_to_ptr.hbm [resolvable:$true] %s24_s30 }
   0x8   :  { %75 = dma.hbm_to_vmem [thread:$0]  %s68_s24, 256, %s70_s28, [#allocation9], %s1789_s25, %s1789_s25, %s1790_s26  }
   0x9   :  { %s1792_s5 = smov [#allocation3]   ;;  %s54_s15 = sshll.u32 %s2725_s4, 4  ;;  %s55_s15 = int_to_ptr.hbm [resolvable:$true] %s54_s15 }
   0xa   :  { %s26_s12 = sshll.u32 %s1792_s5, 4  ;;  %s1793_s16 = smov 64   ;;  %s27_s12 = int_to_ptr.vmem [resolvable:$true] %s26_s12 }
   0xb   :  { %s1794_s17 = smov 4   ;;  %s1795_s18 = smov [#allocation7]  }
   0xc   :  { %32 = dma.hbm_to_vmem [thread:$0]  %s25_s30, 128, %s27_s12, [#allocation4], %s1793_s16, %s1793_s16, %s1794_s17  }
   0xd   :  { %s56_s19 = sshll.u32 %s1795_s18, 4  ;;  %s80_s21 = sshll.u32 %s2727_s6, 4  ;;  %s57_s19 = int_to_ptr.vmem [resolvable:$true] %s56_s19  ;;  %s81_s21 = int_to_ptr.hbm [resolvable:$true] %s80_s21 }
   0xe   :  { %62 = dma.hbm_to_vmem [thread:$0]  %s55_s15, 256, %s57_s19, [#allocation6], %s1789_s25, %s1789_s25, %s1790_s26  }
   0xf   :  { %s93_s4 = sshll.u32 %s2728_s7, 4  ;;  %s1796_s24 = smov [#allocation10]   ;;  %s94_s4 = int_to_ptr.hbm [resolvable:$true] %s93_s4 }
  0x10   :  { %s82_s27 = sshll.u32 %s1796_s24, 4  ;;  %s1797_s28 = smov [#allocation11]   ;;  %s83_s27 = int_to_ptr.vmem [resolvable:$true] %s82_s27 }
  0x11   :  { %88 = dma.hbm_to_vmem [thread:$0]  %s81_s21, 256, %s83_s27, [#allocation9], %s1789_s25, %s1789_s25, %s1790_s26  }
  0x12   :  { %s95_s6 = sshll.u32 %s1797_s28, 4  ;;  %s96_s6 = int_to_ptr.vmem [resolvable:$true] %s95_s6 }
  0x13   :  { %101 = dma.hbm_to_vmem [thread:$0]  %s94_s4, 256, %s96_s6, [#allocation12], %s1789_s25, %s1789_s25, %s1790_s26  }
  0x14   :  { %1780 = dma.done.wait [#allocation4], 128  }
  0x15   :  { %1781 = vsyncadd [#allocation4], 4294967168 }
  0x16   :  { %1782 = dma.done.wait [#allocation6], 512  }
  0x17   :  { %1783 = vsyncadd [#allocation6], 4294966784 }
  0x18   :  { %1784 = dma.done.wait [#allocation9], 512  }
  0x19   :  { %1785 = vsyncadd [#allocation9], 4294966784 }
  0x1a   :  { %1786 = dma.done.wait [#allocation12], 256  }
  0x1b   :  { %1787 = vsyncadd [#allocation12], 4294967040  ;;  %v1896_v0 = vld [vmem:[%s2729_s8 + $0x38] sm:$0xff]  ;;  %v1902_v1 = vld [vmem:[%s2729_s8 + $0x30] sm:$0xff]  ;;  %vm326_vm0 = vcmask 130048  }
  0x1c   :  { %250 = vmatpush.bf16.msra.mxu1 %v1896_v0  ;;  %v1908_v2 = vld [vmem:[%s2729_s8 + $0x28] sm:$0xff]  ;;  %v1914_v3 = vld [vmem:[%s2729_s8 + $0x20] sm:$0xff]  ;;  %v1920_v4 = vld [vmem:[%s2729_s8 + $0x18] sm:$0xff] }
  0x1d   :  { %v1926_v5 = vld [vmem:[%s2729_s8 + $0x10] sm:$0xff]  ;;  %v1932_v6 = vld [vmem:[%s2729_s8 + $0x8] sm:$0xff]  ;;  %v1938_v7 = vld [vmem:[%s2729_s8] sm:$0xff] }
  0x1e   :  { %v1943_v8 = vld [vmem:[%s2730_s9 + $0x38] sm:$0xff]  ;;  %v1563_v9 = vld [vmem:[#allocation3] sm:$0xff]  ;;  %v1950_v10 = vld [vmem:[%s2730_s9 + $0x30] sm:$0xff] }
  0x1f   :  { %v1956_v11 = vld [vmem:[%s2730_s9 + $0x28] sm:$0xff]  ;;  %v1962_v12 = vld [vmem:[%s2730_s9 + $0x20] sm:$0xff]  ;;  %v1968_v13 = vld [vmem:[%s2730_s9 + $0x18] sm:$0xff] }
  0x20   :  { %251 = vmatpush.bf16.msra.mxu1 %v1902_v1  ;;  %v1974_v14 = vld [vmem:[%s2730_s9 + $0x10] sm:$0xff]  ;;  %v1980_v15 = vld [vmem:[%s2730_s9 + $0x8] sm:$0xff]  ;;  %v1986_v16 = vld [vmem:[%s2730_s9] sm:$0xff] }
  0x21   :  { %v140_v19 = vld [vmem:[#allocation7] sm:$0xff]  ;;  %v141_v20 = vld [vmem:[#allocation7 + $0x8] sm:$0xff]  ;;  %v142_v21 = vld [vmem:[#allocation8] sm:$0xff] }
  0x22   :  { %v143_v23 = vld [vmem:[#allocation8 + $0x8] sm:$0xff]  ;;  %v135_v28 = vld [vmem:[%s2722_s1 + $0x8] sm:$0xff]  ;;  %v134_v32 = vld [vmem:[%s2722_s1] sm:$0xff] }
  0x23   :  { %v144_v36 = vld [vmem:[#allocation10] sm:$0xff]  ;;  %v2003_v37 = vld [vmem:[#allocation11] sm:$0xff]  ;;  %v2008_v39 = vld [vmem:[#allocation10 + $0x8] sm:$0xff] }
  0x24   :  { %252 = vmatpush.bf16.msra.mxu1 %v1908_v2  ;;  %v137_v41 = vld [vmem:[%s2723_s2 + $0x8] sm:$0xff]  ;;  %v139_v43 = vld [vmem:[#allocation5 + $0x8] sm:$0xff]  ;;  %v136_v47 = vld [vmem:[%s2723_s2] sm:$0xff] }
  0x25   :  { %v2013_v44 = vld [vmem:[#allocation11 + $0x8] sm:$0xff]  ;;  %v138_v49 = vld [vmem:[#allocation5] sm:$0xff] }
  0x28   :  { %253 = vmatpush.bf16.msra.mxu1 %v1914_v3 }
  0x2c   :  { %254 = vmatpush.bf16.msra.mxu1 %v1920_v4 }
  0x30   :  { %255 = vmatpush.bf16.msra.mxu1 %v1926_v5 }
  0x34   :  { %256 = vmatpush.bf16.msra.mxu1 %v1932_v6 }
  0x38   :  { %257 = vmatpush.bf16.msra.mxu1 %v1938_v7 }
  0x3b   :  { %258 = vmatmul.bf16.vlgmr.msra.gmra.mxu1 %v1563_v9 }
  0x3c   :  { %312 = vmatpush.bf16.msrb.mxu1 %v1943_v8 }
  0x40   :  { %313 = vmatpush.bf16.msrb.mxu1 %v1950_v10 }
  0x44   :  { %314 = vmatpush.bf16.msrb.mxu1 %v1956_v11 }
  0x48   :  { %315 = vmatpush.bf16.msrb.mxu1 %v1962_v12 }
  0x4c   :  { %316 = vmatpush.bf16.msrb.mxu1 %v1968_v13 }
  0x50   :  { %317 = vmatpush.bf16.msrb.mxu1 %v1974_v14 }
  0x54   :  { %318 = vmatpush.bf16.msrb.mxu1 %v1980_v15 }
  0x58   :  { %319 = vmatpush.bf16.msrb.mxu1 %v1986_v16 }
  0x5b   :  { %320 = vmatmul.bf16.vlgmr.msrb.gmra.mxu1 %v1563_v9 }
  0xb8   :  { %v259_v17 = vpop.f32.mrf.mxu1 }
  0xc0   :  { %v261_v18 = vpop.f32.mrf.mxu1 }
  0xc1   :  { %347 = vmatpush.msra.mxu2 %v261_v18 }
  0xc3   :  { %348 = vmatpush.msra.mxu2 %v259_v17 }
  0xc4   :  { %1525 = vmatmul.msk.f32.vlgmr.msra.gmra.mxu2 %vm326_vm0, %v140_v19 }
  0xc5   :  { %401 = vmatpush.msrb.mxu2 %v261_v18  ;;  %v193_v18 = vld [vmem:[%s2731_s10 + $0x68] sm:$0xff] }
  0xc7   :  { %402 = vmatpush.msrb.mxu2 %v259_v17 }
  0xcc   :  { %1526 = vmatmul.msk.f32.gmra.mxu2 %vm326_vm0, %v141_v20 }
  0xd4   :  { %1529 = vmatmul.msk.f32.vlgmr.msrb.gmra.mxu2 %vm326_vm0, %v142_v21 }
  0xd8   :  { %v321_v22 = vpop.f32.mrf.mxu1 }
  0xdc   :  { %1530 = vmatmul.msk.f32.gmra.mxu2 %vm326_vm0, %v143_v23 }
  0xe0   :  { %v323_v24 = vpop.f32.mrf.mxu1 }
  0xe1   :  { %376 = vmatpush.msra.mxu3 %v323_v24 }
  0xe3   :  { %377 = vmatpush.msra.mxu3 %v321_v22 }
  0xe4   :  { %1527 = vmatmul.msk.f32.vlgmr.msra.gmra.mxu3 %vm326_vm0, %v142_v21  ;;  %v190_v21 = vld [vmem:[%s2731_s10 + $0x50] sm:$0xff] }
  0xe5   :  { %424 = vmatpush.msrb.mxu3 %v323_v24 }
  0xe7   :  { %425 = vmatpush.msrb.mxu3 %v321_v22 }
  0xec   :  { %1528 = vmatmul.msk.f32.gmra.mxu3 %vm326_vm0, %v143_v23 }
  0xf4   :  { %1531 = vmatmul.msk.f32.vlgmr.msrb.gmra.mxu3 %vm326_vm0, %v140_v19  ;;  %v192_v19 = vld [vmem:[%s2731_s10 + $0x60] sm:$0xff] }
  0xfc   :  { %1532 = vmatmul.msk.f32.gmra.mxu3 %vm326_vm0, %v141_v20  ;;  %v191_v20 = vld [vmem:[%s2731_s10 + $0x58] sm:$0xff] }
 0x147   :  { %v350_v25 = vpop.f32.mrf.mxu2 }
 0x14f   :  { %v353_v27 = vpop.f32.mrf.mxu2 }
 0x157   :  { %v404_v34 = vpop.f32.mrf.mxu2 }
 0x15f   :  { %v407_v40 = vpop.f32.mrf.mxu2 }
 0x167   :  { %v379_v26 = vpop.f32.mrf.mxu3 }
 0x168   :  { %v385_v30 = vsub.f32 %v350_v25, %v379_v26 }
 0x16a   :  { %v433_v35 = vmul.f32 %v385_v30, %v134_v32  ;;  %v437_v56 = vmul.f32 %v385_v30, %v136_v47  ;;  %v443_v60 = vmul.f32 %v385_v30, %v138_v49 }
 0x16f   :  { %v382_v29 = vpop.f32.mrf.mxu3 }
 0x170   :  { %v386_v31 = vsub.f32 %v353_v27, %v382_v29 }
 0x172   :  { %v434_v33 = vmul.f32 %v386_v31, %v135_v28  ;;  %v438_v48 = vmul.f32 %v386_v31, %v137_v41  ;;  %v444_v50 = vmul.f32 %v386_v31, %v139_v43 }
 0x174   :  { %498 = vmatpush.msra.mxu3 %v434_v33  ;;  %544 = vmatpush.msra.mxu1 %v434_v33  ;;  %v189_v33 = vld [vmem:[%s2731_s10 + $0x48] sm:$0xff] }
 0x176   :  { %499 = vmatpush.msra.mxu3 %v433_v35  ;;  %545 = vmatpush.msra.mxu1 %v433_v35  ;;  %v187_v35 = vld [vmem:[%s2731_s10 + $0x38] sm:$0xff] }
 0x177   :  { %v427_v38 = vpop.f32.mrf.mxu3  ;;  %1535 = vmatmul.msk.f32.vlgmr.msra.gmra.mxu3 %vm326_vm0, %v144_v36  ;;  %1539 = vmatmul.msk.f32.vlgmr.msra.gmra.mxu1 %vm326_vm0, %v2003_v37 }
 0x178   :  { %v428_v42 = vadd.f32 %v427_v38, %v404_v34  ;;  %v188_v34 = vld [vmem:[%s2731_s10 + $0x40] sm:$0xff] }
 0x179   :  { %v184_v38 = vld [vmem:[%s2731_s10 + $0x20] sm:$0xff] }
 0x17a   :  { %v439_v51 = vmul.f32 %v428_v42, %v138_v49  ;;  %v445_v55 = vmul.f32 %v428_v42, %v136_v47  ;;  %v435_v58 = vmul.f32 %v428_v42, %v134_v32  ;;  %v180_v42 = vld [vmem:[%s2731_s10] sm:$0xff] }
 0x17c   :  { %v441_v61 = vsub.f32 %v437_v56, %v439_v51  ;;  %v447_v62 = vadd.f32 %v445_v55, %v443_v60 }
 0x17f   :  { %v430_v45 = vpop.f32.mrf.mxu3  ;;  %1536 = vmatmul.msk.f32.gmra.mxu3 %vm326_vm0, %v2008_v39  ;;  %1540 = vmatmul.msk.f32.gmra.mxu1 %vm326_vm0, %v2013_v44 }
 0x180   :  { %v431_v46 = vadd.f32 %v430_v45, %v407_v40  ;;  %v182_v40 = vld [vmem:[%s2731_s10 + $0x10] sm:$0xff] }
 0x182   :  { %v436_v52 = vmul.f32 %v431_v46, %v135_v28  ;;  %v440_v53 = vmul.f32 %v431_v46, %v139_v43  ;;  %v446_v54 = vmul.f32 %v431_v46, %v137_v41  ;;  %v181_v41 = vld [vmem:[%s2731_s10 + $0x8] sm:$0xff] }
 0x184   :  { %v442_v57 = vsub.f32 %v438_v48, %v440_v53  ;;  %469 = vmatpush.msra.mxu2 %v436_v52  ;;  %v448_v59 = vadd.f32 %v446_v54, %v444_v50 }
 0x186   :  { %470 = vmatpush.msra.mxu2 %v435_v58  ;;  %592 = vmatpush.msrb.mxu3 %v442_v57 }
 0x187   :  { %615 = vmatpush.msra.mxu0 %v448_v59  ;;  %638 = vmatpush.msrb.mxu1 %v442_v57 }
 0x188   :  { %1533 = vmatmul.msk.f32.vlgmr.msra.gmra.mxu2 %vm326_vm0, %v2003_v37  ;;  %593 = vmatpush.msrb.mxu3 %v441_v61 }
 0x189   :  { %521 = vmatpush.msrb.mxu2 %v436_v52  ;;  %616 = vmatpush.msra.mxu0 %v447_v62 }
 0x18a   :  { %639 = vmatpush.msrb.mxu1 %v441_v61  ;;  %1543 = vmatmul.msk.f32.vlgmr.msrb.gmra.mxu3 %vm326_vm0, %v144_v36 }
 0x18b   :  { %522 = vmatpush.msrb.mxu2 %v435_v58  ;;  %1545 = vmatmul.msk.f32.vlgmr.msra.gmra.mxu0 %vm326_vm0, %v144_v36 }
 0x18c   :  { %1547 = vmatmul.msk.f32.vlgmr.msrb.gmra.mxu1 %vm326_vm0, %v2003_v37  ;;  %667 = vmatpush.bf16.msra.mxu3 %v1896_v0 }
 0x18d   :  { %569 = vmatpush.msra.mxu2 %v448_v59  ;;  %681 = vmatpush.bf16.msrb.mxu0 %v1943_v8 }
 0x18e   :  { %695 = vmatpush.bf16.msra.mxu1 %v1896_v0 }
 0x18f   :  { %570 = vmatpush.msra.mxu2 %v447_v62 }
 0x190   :  { %1534 = vmatmul.msk.f32.gmra.mxu2 %vm326_vm0, %v2013_v44  ;;  %668 = vmatpush.bf16.msra.mxu3 %v1902_v1 }
 0x191   :  { %682 = vmatpush.bf16.msrb.mxu0 %v1950_v10 }
 0x192   :  { %1544 = vmatmul.msk.f32.gmra.mxu3 %vm326_vm0, %v2008_v39  ;;  %696 = vmatpush.bf16.msra.mxu1 %v1902_v1 }
 0x193   :  { %1546 = vmatmul.msk.f32.gmra.mxu0 %vm326_vm0, %v2008_v39 }
 0x194   :  { %1548 = vmatmul.msk.f32.gmra.mxu1 %vm326_vm0, %v2013_v44  ;;  %669 = vmatpush.bf16.msra.mxu3 %v1908_v2 }
 0x195   :  { %683 = vmatpush.bf16.msrb.mxu0 %v1956_v11 }
 0x196   :  { %697 = vmatpush.bf16.msra.mxu1 %v1908_v2 }
 0x198   :  { %1537 = vmatmul.msk.f32.vlgmr.msrb.gmra.mxu2 %vm326_vm0, %v144_v36  ;;  %670 = vmatpush.bf16.msra.mxu3 %v1914_v3  ;;  %v186_v36 = vld [vmem:[%s2731_s10 + $0x30] sm:$0xff] }
 0x199   :  { %653 = vmatpush.bf16.msrb.mxu2 %v1943_v8  ;;  %684 = vmatpush.bf16.msrb.mxu0 %v1962_v12 }
 0x19a   :  { %698 = vmatpush.bf16.msra.mxu1 %v1914_v3 }
 0x19c   :  { %671 = vmatpush.bf16.msra.mxu3 %v1920_v4 }
 0x19d   :  { %654 = vmatpush.bf16.msrb.mxu2 %v1950_v10  ;;  %685 = vmatpush.bf16.msrb.mxu0 %v1968_v13 }
 0x19e   :  { %699 = vmatpush.bf16.msra.mxu1 %v1920_v4 }
 0x1a0   :  { %1538 = vmatmul.msk.f32.gmra.mxu2 %vm326_vm0, %v2008_v39  ;;  %672 = vmatpush.bf16.msra.mxu3 %v1926_v5  ;;  %v183_v39 = vld [vmem:[%s2731_s10 + $0x18] sm:$0xff] }
 0x1a1   :  { %655 = vmatpush.bf16.msrb.mxu2 %v1956_v11  ;;  %686 = vmatpush.bf16.msrb.mxu0 %v1974_v14 }
 0x1a2   :  { %700 = vmatpush.bf16.msra.mxu1 %v1926_v5 }
 0x1a4   :  { %673 = vmatpush.bf16.msra.mxu3 %v1932_v6 }
 0x1a5   :  { %656 = vmatpush.bf16.msrb.mxu2 %v1962_v12  ;;  %687 = vmatpush.bf16.msrb.mxu0 %v1980_v15 }
 0x1a6   :  { %701 = vmatpush.bf16.msra.mxu1 %v1932_v6 }
 0x1a8   :  { %1541 = vmatmul.msk.f32.vlgmr.msra.gmra.mxu2 %vm326_vm0, %v2003_v37  ;;  %674 = vmatpush.bf16.msra.mxu3 %v1938_v7  ;;  %v185_v37 = vld [vmem:[%s2731_s10 + $0x28] sm:$0xff] }
 0x1a9   :  { %657 = vmatpush.bf16.msrb.mxu2 %v1968_v13  ;;  %688 = vmatpush.bf16.msrb.mxu0 %v1986_v16 }
 0x1aa   :  { %702 = vmatpush.bf16.msra.mxu1 %v1938_v7 }
 0x1ac   :  { %723 = vmatpush.bf16.msrb.mxu3 %v1943_v8 }
 0x1ad   :  { %658 = vmatpush.bf16.msrb.mxu2 %v1974_v14 }
 0x1b0   :  { %724 = vmatpush.bf16.msrb.mxu3 %v1950_v10  ;;  %1542 = vmatmul.msk.f32.gmra.mxu2 %vm326_vm0, %v2013_v44 }
 0x1b1   :  { %659 = vmatpush.bf16.msrb.mxu2 %v1980_v15 }
 0x1b4   :  { %725 = vmatpush.bf16.msrb.mxu3 %v1956_v11 }
 0x1b5   :  { %660 = vmatpush.bf16.msrb.mxu2 %v1986_v16 }
 0x1b8   :  { %726 = vmatpush.bf16.msrb.mxu3 %v1962_v12 }
 0x1b9   :  { %709 = vmatpush.bf16.msra.mxu2 %v1896_v0 }
 0x1bc   :  { %727 = vmatpush.bf16.msrb.mxu3 %v1968_v13 }
 0x1bd   :  { %710 = vmatpush.bf16.msra.mxu2 %v1902_v1 }
 0x1c0   :  { %728 = vmatpush.bf16.msrb.mxu3 %v1974_v14 }
 0x1c1   :  { %711 = vmatpush.bf16.msra.mxu2 %v1908_v2 }
 0x1c4   :  { %729 = vmatpush.bf16.msrb.mxu3 %v1980_v15 }
 0x1c5   :  { %712 = vmatpush.bf16.msra.mxu2 %v1914_v3 }
 0x1c8   :  { %730 = vmatpush.bf16.msrb.mxu3 %v1986_v16 }
 0x1c9   :  { %713 = vmatpush.bf16.msra.mxu2 %v1920_v4 }
 0x1cd   :  { %714 = vmatpush.bf16.msra.mxu2 %v1926_v5 }
 0x1d1   :  { %715 = vmatpush.bf16.msra.mxu2 %v1932_v6  ;;  %v195_v6 = vld [vmem:[%s2731_s10 + $0x78] sm:$0xff] }
 0x1d2   :  { %821 = vmatpush.msra.mxu0 %v195_v6 }
 0x1d5   :  { %716 = vmatpush.bf16.msra.mxu2 %v1938_v7  ;;  %v194_v7 = vld [vmem:[%s2731_s10 + $0x70] sm:$0xff] }
 0x1d6   :  { %822 = vmatpush.msra.mxu0 %v194_v7 }
 0x1d8   :  { %823 = vmatpush.msra.mxu0 %v193_v18 }
 0x1da   :  { %824 = vmatpush.msra.mxu0 %v192_v19 }
 0x1dc   :  { %825 = vmatpush.msra.mxu0 %v191_v20 }
 0x1de   :  { %826 = vmatpush.msra.mxu0 %v190_v21 }
 0x1e0   :  { %827 = vmatpush.msra.mxu0 %v189_v33 }
 0x1e2   :  { %828 = vmatpush.msra.mxu0 %v188_v34 }
 0x1e4   :  { %829 = vmatpush.msra.mxu0 %v187_v35 }
 0x1e6   :  { %830 = vmatpush.msra.mxu0 %v186_v36 }
 0x1e8   :  { %831 = vmatpush.msra.mxu0 %v185_v37 }
 0x1ea   :  { %832 = vmatpush.msra.mxu0 %v184_v38 }
 0x1ec   :  { %833 = vmatpush.msra.mxu0 %v183_v39 }
 0x1ee   :  { %834 = vmatpush.msra.mxu0 %v182_v40 }
 0x1f0   :  { %835 = vmatpush.msra.mxu0 %v181_v41 }
 0x1f2   :  { %836 = vmatpush.msra.mxu0 %v180_v42 }
 0x1f4   :  { %v547_v63 = vpop.f32.mrf.mxu1 }
 0x1fa   :  { %v501_v1 = vpop.f32.mrf.mxu3 }
 0x1fc   :  { %v550_v0 = vpop.f32.mrf.mxu1 }
 0x202   :  { %v504_v11 = vpop.f32.mrf.mxu3 }
 0x208   :  { %v618_v2 = vpop.f32.mrf.mxu0 }
 0x209   :  { %v641_v8 = vpop.f32.mrf.mxu1 }
 0x20a   :  { %v647_v10 = vsub.f32 %v618_v2, %v641_v8 }
 0x20b   :  { %v472_v9 = vpop.f32.mrf.mxu2 }
 0x20c   :  { %v502_v14 = vadd.f32 %v501_v1, %v472_v9 }
 0x20d   :  { %v595_v26 = vpop.f32.mrf.mxu3 }
 0x210   :  { %v621_v3 = vpop.f32.mrf.mxu0 }
 0x211   :  { %v644_v12 = vpop.f32.mrf.mxu1 }
 0x212   :  { %v648_v13 = vsub.f32 %v621_v3, %v644_v12 }
 0x213   :  { %v475_v4 = vpop.f32.mrf.mxu2 }
 0x214   :  { %v505_v15 = vadd.f32 %v504_v11, %v475_v4  ;;  %v652_v16 = vpack.c.bf16 %v648_v13, %v647_v10 }
 0x215   :  { %v598_v28 = vpop.f32.mrf.mxu3 }
 0x216   :  { %v649_v5 = vpack.c.bf16 %v505_v15, %v502_v14  ;;  %689 = vmatmul.bf16.vlgmr.msrb.gmra.mxu0 %v652_v16 }
 0x218   :  { %675 = vmatmul.bf16.vlgmr.msra.gmra.mxu3 %v649_v5 }
 0x21b   :  { %v524_v17 = vpop.f32.mrf.mxu2 }
 0x21c   :  { %v553_v23 = vsub.f32 %v524_v17, %v547_v63 }
 0x223   :  { %v527_v22 = vpop.f32.mrf.mxu2 }
 0x224   :  { %v554_v24 = vsub.f32 %v527_v22, %v550_v0 }
 0x226   :  { %v650_v25 = vpack.c.bf16 %v554_v24, %v553_v23 }
 0x228   :  { %661 = vmatmul.bf16.vlgmr.msrb.gmra.mxu2 %v650_v25 }
 0x22b   :  { %v572_v27 = vpop.f32.mrf.mxu2 }
 0x22c   :  { %v596_v30 = vadd.f32 %v595_v26, %v572_v27 }
 0x233   :  { %v575_v29 = vpop.f32.mrf.mxu2 }
 0x234   :  { %v599_v31 = vadd.f32 %v598_v28, %v575_v29 }
 0x236   :  { %v651_v32 = vpack.c.bf16 %v599_v31, %v596_v30 }
 0x238   :  { %717 = vmatmul.bf16.vlgmr.msra.gmra.mxu2 %v652_v16  ;;  %731 = vmatmul.bf16.vlgmr.msrb.gmra.mxu3 %v651_v32 }
 0x239   :  { %703 = vmatmul.bf16.vlgmr.msra.gmra.mxu1 %v651_v32 }
 0x293   :  { %v690_v50 = vpop.f32.mrf.mxu0 }
 0x29b   :  { %v676_v43 = vpop.f32.mrf.mxu3  ;;  %v692_v60 = vpop.f32.mrf.mxu0 }
 0x2a3   :  { %v678_v46 = vpop.f32.mrf.mxu3 }
 0x2ab   :  { %v662_v44 = vpop.f32.mrf.mxu2 }
 0x2ac   :  { %v2139_v45 = vadd.f32 %v676_v43, %v662_v44 }
 0x2ae   :  { %837 = vmatmul.f32.vlgmr.msra.gmra.mxu0 %v2139_v45  ;;  %v745_v58 = vmul.f32 %v2139_v45, %v2139_v45  ;;  %v797_v43 = vand.u32 2147483647, %v2139_v45 }
 0x2b3   :  { %v664_v47 = vpop.f32.mrf.mxu2 }
 0x2b4   :  { %v2142_v48 = vadd.f32 %v678_v46, %v664_v47 }
 0x2b6   :  { %840 = vmatmul.f32.gmra.mxu0 %v2142_v48  ;;  %v704_v49 = vpop.f32.mrf.mxu1  ;;  %v746_v9 = vmul.f32 %v2142_v48, %v2142_v48 }
 0x2b7   :  { %v705_v51 = vadd.f32 %v704_v49, %v690_v50 }
 0x2b9   :  { %v739_v55 = vmul.f32 %v705_v51, %v705_v51 }
 0x2bb   :  { %v718_v52 = vpop.f32.mrf.mxu2  ;;  %v732_v53 = vpop.f32.mrf.mxu3 }
 0x2bc   :  { %v737_v54 = vsub.f32 %v718_v52, %v732_v53 }
 0x2be   :  { %v741_v56 = vmul.f32 %v737_v54, %v737_v54  ;;  %843 = vmatmul.f32.gmra.mxu0 %v705_v51  ;;  %v706_v57 = vpop.f32.mrf.mxu1  ;;  %v798_v51 = vand.u32 2147483647, %v2142_v48 }
 0x2bf   :  { %v707_v61 = vadd.f32 %v706_v57, %v692_v60 }
 0x2c0   :  { %v2147_v59 = vadd.f32 %v741_v56, %v739_v55 }
 0x2c1   :  { %v740_v2 = vmul.f32 %v707_v61, %v707_v61 }
 0x2c2   :  { %v747_v62 = vadd.f32 %v745_v58, %v2147_v59  ;;  %vm780_vm5 = vcmp.eq.f32.partialorder %v2147_v59, inf  ;;  %v783_v41 = vand.u32 2147483648, %v2147_v59  ;;  %vm782_vm6 = vcmp.eq.f32.partialorder %v2147_v59, 0.0 }
 0x2c3   :  { %v720_v63 = vpop.f32.mrf.mxu2  ;;  %v734_v0 = vpop.f32.mrf.mxu3 }
 0x2c4   :  { %v738_v1 = vsub.f32 %v720_v63, %v734_v0  ;;  %1592 = vrsqrt.f32 %v747_v62  ;;  %vm756_vm1 = vcmp.eq.f32.partialorder %v747_v62, inf  ;;  %v759_v28 = vand.u32 2147483648, %v747_v62 }
 0x2c5   :  { %1594 = vrsqrt.f32 %v2147_v59  ;;  %vm758_vm2 = vcmp.eq.f32.partialorder %v747_v62, 0.0 }
 0x2c6   :  { %v742_v8 = vmul.f32 %v738_v1, %v738_v1  ;;  %846 = vmatmul.f32.gmra.mxu0 %v707_v61 }
 0x2c8   :  { %v744_v10 = vadd.f32 %v742_v8, %v740_v2 }
 0x2ca   :  { %v1593_v3 = vpop.eup %1592  ;;  %v748_v11 = vadd.f32 %v746_v9, %v744_v10  ;;  %vm792_vm7 = vcmp.eq.f32.partialorder %v744_v10, inf  ;;  %v795_v49 = vand.u32 2147483648, %v744_v10  ;;  %vm794_vm8 = vcmp.eq.f32.partialorder %v744_v10, 0.0 }
 0x2cb   :  { %v1595_v12 = vpop.eup %1594  ;;  %v750_v13 = vmul.f32 %v1593_v3, %v747_v62 }
 0x2cc   :  { %1596 = vrsqrt.f32 %v748_v11  ;;  %v774_v14 = vmul.f32 %v1595_v12, %v2147_v59  ;;  %vm768_vm3 = vcmp.eq.f32.partialorder %v748_v11, inf  ;;  %v771_v37 = vand.u32 2147483648, %v748_v11 }
 0x2cd   :  { %v751_v4 = vmul.f32 %v1593_v3, %v750_v13  ;;  %1598 = vrsqrt.f32 %v744_v10  ;;  %vm770_vm4 = vcmp.eq.f32.partialorder %v748_v11, 0.0 }
 0x2ce   :  { %849 = vmatmul.f32.gmra.mxu0 %v737_v54  ;;  %v775_v6 = vmul.f32 %v1595_v12, %v774_v14 }
 0x2cf   :  { %v752_v15 = vmul.f32 0.5, %v751_v4 }
 0x2d0   :  { %v776_v21 = vmul.f32 0.5, %v775_v6 }
 0x2d1   :  { %v753_v16 = vsub.f32 1.5, %v752_v15 }
 0x2d2   :  { %v1597_v5 = vpop.eup %1596  ;;  %v777_v26 = vsub.f32 1.5, %v776_v21 }
 0x2d3   :  { %v1599_v7 = vpop.eup %1598  ;;  %v754_v17 = vmul.f32 %v1593_v3, %v753_v16  ;;  %v762_v18 = vmul.f32 %v1597_v5, %v748_v11 }
 0x2d4   :  { %v786_v22 = vmul.f32 %v1599_v7, %v744_v10  ;;  %v778_v32 = vmul.f32 %v1595_v12, %v777_v26 }
 0x2d5   :  { %v763_v19 = vmul.f32 %v1597_v5, %v762_v18  ;;  %v755_v20 = vmul.f32 %v754_v17, %v747_v62 }
 0x2d6   :  { %852 = vmatmul.f32.gmra.mxu0 %v738_v1  ;;  %v787_v27 = vmul.f32 %v1599_v7, %v786_v22  ;;  %v779_v35 = vmul.f32 %v778_v32, %v2147_v59 }
 0x2d7   :  { %v764_v23 = vmul.f32 0.5, %v763_v19  ;;  %v757_v25 = vsel %vm756_vm1, %v747_v62, %v755_v20 }
 0x2d8   :  { %v760_v30 = vsel %vm758_vm2, %v759_v28, %v757_v25  ;;  %v788_v33 = vmul.f32 0.5, %v787_v27  ;;  %v781_v39 = vsel %vm780_vm5, %v2147_v59, %v779_v35 }
 0x2d9   :  { %v765_v24 = vsub.f32 1.5, %v764_v23  ;;  %v784_v42 = vsel %vm782_vm6, %v783_v41, %v781_v39 }
 0x2da   :  { %v789_v36 = vsub.f32 1.5, %v788_v33  ;;  %v799_v46 = vsub.f32 %v784_v42, %v797_v43 }
 0x2db   :  { %v766_v29 = vmul.f32 %v1597_v5, %v765_v24  ;;  %v1798_v24 = vmov 0.0  }
 0x2dc   :  { %v790_v40 = vmul.f32 %v1599_v7, %v789_v36 }
 0x2dd   :  { %v767_v31 = vmul.f32 %v766_v29, %v748_v11 }
 0x2de   :  { %855 = vmatmul.f32.gmra.mxu0 %v760_v30  ;;  %v791_v44 = vmul.f32 %v790_v40, %v744_v10 }
 0x2df   :  { %v769_v34 = vsel %vm768_vm3, %v748_v11, %v767_v31 }
 0x2e0   :  { %v772_v38 = vsel %vm770_vm4, %v771_v37, %v769_v34  ;;  %v793_v47 = vsel %vm792_vm7, %v744_v10, %v791_v44 }
 0x2e1   :  { %v796_v50 = vsel %vm794_vm8, %v795_v49, %v793_v47  ;;  %vm1799_vm8 = vmmov 1  }
 0x2e2   :  { %v800_v52 = vsub.f32 %v796_v50, %v798_v51 }
 0x2e6   :  { %858 = vmatmul.f32.gmra.mxu0 %v772_v38 }
 0x2ee   :  { %861 = vmatmul.f32.gmra.mxu0 %v799_v46 }
 0x2f6   :  { %864 = vmatmul.f32.gmra.mxu0 %v800_v52 }
 0x32b   :  { %v2161_v53 = vpop.f32.mrf.mxu0 }
 0x333   :  { %v2163_v54 = vpop.f32.mrf.mxu0 }
 0x33b   :  { %v2165_v55 = vpop.f32.mrf.mxu0 }
 0x33c   :  { %vm2734_vm9 = vcmp.eq.f32.partialorder %v2165_v55, 0.0  ;;  %v1072_v11 = vmul.f32 %v2165_v55, %v2165_v55 }
 0x33d   :  { %v906_v45 = vsel %vm2734_vm9, 1.0, %v2165_v55 }
 0x33e   :  { %1600 = vrcp.f32 %v906_v45  ;;  %v919_v60 = vand.u32 2147483648, %v906_v45  ;;  %v917_v62 = vand.u32 2147483647, %v906_v45  ;;  %vm913_vm12 = vweird.f32 %v906_v45 }
 0x340   :  { %v920_v2 = vor.u32 1.1754944e-38, %v919_v60  ;;  %vm918_vm14 = vcmp.eq.f32.partialorder %v917_v62, 8.507059e+37 }
 0x343   :  { %v2171_v56 = vpop.f32.mrf.mxu0 }
 0x344   :  { %v1601_v57 = vpop.eup %1600  ;;  %vm2733_vm10 = vcmp.eq.f32.partialorder %v2171_v56, 0.0  ;;  %v1073_v27 = vmul.f32 %v2171_v56, %v2171_v56 }
 0x345   :  { %v909_v48 = vmul.f32 %v1601_v57, %v906_v45  ;;  %v907_v58 = vsel %vm2733_vm10, 1.0, %v2171_v56  ;;  %vm914_vm11 = vweird.f32 %v1601_v57 }
 0x346   :  { %1602 = vrcp.f32 %v907_v58  ;;  %vm915_vm13 = vmor %vm913_vm12, %vm914_vm11  ;;  %v932_v6 = vand.u32 2147483647, %v907_v58  ;;  %v934_v7 = vand.u32 2147483648, %v907_v58  ;;  %vm928_vm1 = vweird.f32 %v907_v58 }
 0x347   :  { %v910_v59 = vsub.f32 1.0, %v909_v48 }
 0x348   :  { %v935_v21 = vor.u32 1.1754944e-38, %v934_v7  ;;  %vm933_vm4 = vcmp.eq.f32.partialorder %v932_v6, 8.507059e+37 }
 0x349   :  { %v911_v61 = vmul.f32 %v1601_v57, %v910_v59 }
 0x34b   :  { %v912_v63 = vadd.f32 %v1601_v57, %v911_v61  ;;  %v850_v0 = vpop.f32.mrf.mxu0 }
 0x34c   :  { %v1603_v1 = vpop.eup %1602  ;;  %v2177_v8 = vsub.f32 0.0, %v850_v0  ;;  %v1074_v9 = vmul.f32 %v850_v0, %v850_v0 }
 0x34d   :  { %v924_v10 = vmul.f32 %v1603_v1, %v907_v58  ;;  %v916_v3 = vsel %vm915_vm13, %v1601_v57, %v912_v63  ;;  %vm929_vm15 = vweird.f32 %v1603_v1 }
 0x34e   :  { %v921_v12 = vsel %vm918_vm14, %v920_v2, %v916_v3  ;;  %v1076_v14 = vadd.f32 %v1074_v9, %v1072_v11  ;;  %vm1064_vm2 = vcmp.lt.f32.partialorder %v2177_v8, 0.0  ;;  %vm930_vm3 = vmor %vm928_vm1, %vm929_vm15 }
 0x34f   :  { %v925_v13 = vsub.f32 1.0, %v924_v10  ;;  %v2182_v4 = vmul.f32 %v921_v12, %v2177_v8  ;;  %v2202_v25 = vsel %vm1064_vm2, -1.5707964, %v1798_v24 }
 0x350   :  { %v2187_v5 = vadd.f32 1e-30, %v1076_v14 }
 0x351   :  { %v926_v15 = vmul.f32 %v1603_v1, %v925_v13  ;;  %v2185_v16 = vand.u32 2147483647, %v2182_v4 }
 0x352   :  { %1604 = vrsqrt.f32 %v2187_v5  ;;  %vm1086_vm7 = vweird.f32 %v2187_v5 }
 0x353   :  { %vm940_vm0 = vcmp.gt.f32.partialorder %v2185_v16, 2.4142137  ;;  %v853_v17 = vpop.f32.mrf.mxu0  ;;  %v927_v18 = vadd.f32 %v1603_v1, %v926_v15  ;;  %v2194_v20 = vadd.f32 1.0, %v2185_v16  ;;  %vm942_vm5 = vcmp.gt.f32.partialorder %v2185_v16, 0.41421357 }
 0x354   :  { %v948_v19 = vsel %vm940_vm0, %v2185_v16, 1.0  ;;  %v2199_v22 = vsub.f32 0.0, %v853_v17  ;;  %v2210_v30 = vadd.f32 -1.0, %v2185_v16  ;;  %vm944_vm11 = vmxor %vm940_vm0, %vm1799_vm8  ;;  %v1075_v39 = vmul.f32 %v853_v17, %v853_v17 }
 0x355   :  { %1606 = vrcp.f32 %v948_v19  ;;  %v931_v23 = vsel %vm930_vm3, %v1603_v1, %v927_v18  ;;  %v959_v29 = vand.u32 2147483647, %v948_v19  ;;  %vm955_vm6 = vweird.f32 %v948_v19  ;;  %vm2239_vm1 = vmand %vm942_vm5, %vm944_vm11 }
 0x356   :  { %1608 = vrcp.f32 %v2194_v20  ;;  %v936_v26 = vsel %vm933_vm4, %v935_v21, %v931_v23  ;;  %v961_v33 = vand.u32 2147483648, %v948_v19  ;;  %vm989_vm12 = vweird.f32 %v2194_v20 }
 0x357   :  { %v2213_v31 = vmul.f32 %v936_v26, %v2199_v22  ;;  %v993_v41 = vand.u32 2147483647, %v2194_v20  ;;  %v995_v42 = vand.u32 2147483648, %v2194_v20  ;;  %vm2231_vm13 = vcmp.eq.f32.partialorder %v959_v29, 8.507059e+37 }
 0x358   :  { %v2206_v28 = vpop.eup %1604  ;;  %v1077_v57 = vadd.f32 %v1075_v39, %v1073_v27  ;;  %v962_v60 = vor.u32 1.1754944e-38, %v961_v33  ;;  %v2260_v62 = vsel %vm2239_vm1, 0.7853982, %v1798_v24 }
 0x359   :  { %v1081_v34 = vmul.f32 %v2206_v28, %v2187_v5  ;;  %v2225_v38 = vand.u32 2147483647, %v2213_v31  ;;  %vm1087_vm14 = vweird.f32 %v2206_v28  ;;  %vm2253_vm4 = vcmp.eq.f32.partialorder %v993_v41, 8.507059e+37 }
 0x35a   :  { %vm2266_vm5 = vmor %vm1086_vm7, %vm1087_vm14  ;;  %v996_v1 = vor.u32 1.1754944e-38, %v995_v42  ;;  %v2280_v12 = vadd.f32 1e-30, %v1077_v57 }
 0x35b   :  { %v1607_v32 = vpop.eup %1606  ;;  %v2218_v35 = vpop.f32.mrf.mxu0  ;;  %v1082_v43 = vmul.f32 %v2206_v28, %v1081_v34  ;;  %vm941_vm15 = vcmp.gt.f32.partialorder %v2225_v38, 2.4142137  ;;  %v2249_v52 = vadd.f32 1.0, %v2225_v38  ;;  %vm943_vm9 = vcmp.gt.f32.partialorder %v2225_v38, 0.41421357 }
 0x35c   :  { %v1609_v36 = vpop.eup %1608  ;;  %v951_v37 = vmul.f32 %v1607_v32, %v948_v19  ;;  %v2246_v51 = vsel %vm941_vm15, %v2225_v38, 1.0  ;;  %vm956_vm2 = vweird.f32 %v1607_v32  ;;  %v2278_v11 = vadd.f32 -1.0, %v2225_v38  ;;  %vm945_vm7 = vmxor %vm941_vm15, %vm1799_vm8 }
 0x35d   :  { %v985_v40 = vmul.f32 %v1609_v36, %v2194_v20  ;;  %v1083_v50 = vmul.f32 0.5, %v1082_v43  ;;  %1610 = vrcp.f32 %v2246_v51  ;;  %vm990_vm3 = vweird.f32 %v1609_v36  ;;  %vm957_vm11 = vmor %vm955_vm6, %vm956_vm2 }
 0x35e   :  { %v952_v44 = vsub.f32 1.0, %v951_v37  ;;  %1612 = vrcp.f32 %v2249_v52  ;;  %v974_v9 = vand.u32 2147483647, %v2246_v51  ;;  %vm991_vm10 = vmor %vm989_vm12, %vm990_vm3  ;;  %vm970_vm6 = vweird.f32 %v2246_v51 }
 0x35f   :  { %v986_v49 = vsub.f32 1.0, %v985_v40  ;;  %v1084_v58 = vsub.f32 1.5, %v1083_v50  ;;  %v976_v18 = vand.u32 2147483648, %v2246_v51  ;;  %vm1004_vm12 = vweird.f32 %v2249_v52 }
 0x360   :  { %v953_v45 = vmul.f32 %v1607_v32, %v952_v44  ;;  %1614 = vrsqrt.f32 %v2280_v12  ;;  %v1008_v27 = vand.u32 2147483647, %v2249_v52  ;;  %v2321_v33 = vadd.f32 0.0001, %v2218_v35 }
 0x361   :  { %v987_v48 = vmul.f32 %v1609_v36, %v986_v49  ;;  %v1085_v2 = vmul.f32 %v2206_v28, %v1084_v58  ;;  %v977_v37 = vor.u32 1.1754944e-38, %v976_v18  ;;  %vm1096_vm3 = vweird.f32 %v2280_v12 }
 0x362   :  { %v954_v59 = vadd.f32 %v1607_v32, %v953_v45  ;;  %1616 = vrcp.f32 %v2321_v33  ;;  %v881_v58 = vand.u32 2147483647, %v2321_v33  ;;  %v883_v61 = vand.u32 2147483648, %v2321_v33 }
 0x363   :  { %v988_v0 = vadd.f32 %v1609_v36, %v987_v48  ;;  %v859_v10 = vpop.f32.mrf.mxu0  ;;  %v1089_v15 = vsel %vm2266_vm5, %v2206_v28, %v1085_v2  ;;  %v1611_v5 = vpop.eup %1610  ;;  %v1010_v28 = vand.u32 2147483648, %v2249_v52  ;;  %vm877_vm5 = vweird.f32 %v2321_v33 }
 0x364   :  { %v958_v3 = vsel %vm957_vm11, %v1607_v32, %v954_v59  ;;  %v2291_v17 = vmul.f32 %v1089_v15, %v2161_v53  ;;  %v1613_v19 = vpop.eup %1612  ;;  %v966_v21 = vmul.f32 %v1611_v5, %v2246_v51  ;;  %v2323_v34 = vadd.f32 0.0001, %v859_v10 }
 0x365   :  { %v963_v13 = vsel %vm2231_vm13, %v962_v60, %v958_v3  ;;  %v992_v14 = vsel %vm991_vm10, %v1609_v36, %v988_v0  ;;  %vm2299_vm10 = vcmp.eq.f32.partialorder %v974_v9, 8.507059e+37  ;;  %v1000_v26 = vmul.f32 %v1613_v19, %v2249_v52  ;;  %vm2316_vm13 = vmand %vm943_vm9, %vm945_vm7 }
 0x366   :  { %v964_v6 = vmul.f32 -1.0, %v963_v13  ;;  %v997_v7 = vsel %vm2253_vm4, %v996_v1, %v992_v14  ;;  %v2306_v53 = vand.u32 2147483647, %v2291_v17  ;;  %v967_v32 = vsub.f32 1.0, %v966_v21  ;;  %v1615_v46 = vpop.eup %1614 }
 0x367   :  { %v998_v20 = vmul.f32 %v2210_v30, %v997_v7  ;;  %vm971_vm14 = vweird.f32 %v1611_v5  ;;  %v1001_v39 = vsub.f32 1.0, %v1000_v26  ;;  %vm1005_vm9 = vweird.f32 %v1613_v19 }
 0x368   :  { %v2334_v41 = vadd.f32 1.0, %v2306_v53  ;;  %v968_v42 = vmul.f32 %v1611_v5, %v967_v32  ;;  %v2344_v44 = vsel %vm2316_vm13, 0.7853982, %v1798_v24  ;;  %v1011_v50 = vor.u32 1.1754944e-38, %v1010_v28  ;;  %vm972_vm2 = vmor %vm970_vm6, %vm971_vm14  ;;  %v1617_v2 = vpop.eup %1616 }
 0x369   :  { %v1014_v29 = vsel %vm2239_vm1, %v998_v20, %v2185_v16  ;;  %v1002_v35 = vmul.f32 %v1613_v19, %v1001_v39  ;;  %vm2337_vm1 = vcmp.eq.f32.partialorder %v1008_v27, 8.507059e+37  ;;  %1618 = vrcp.f32 %v2323_v34  ;;  %vm1006_vm4 = vmor %vm1004_vm12, %vm1005_vm9 }
 0x36a   :  { %v2327_v36 = vsel %vm940_vm0, %v964_v6, %v1014_v29  ;;  %v969_v49 = vadd.f32 %v1611_v5, %v968_v42  ;;  %v1091_v48 = vmul.f32 %v1615_v46, %v2280_v12  ;;  %1620 = vrcp.f32 %v2334_v41 }
 0x36b   :  { %v2331_v40 = vmul.f32 %v2327_v36, %v2327_v36  ;;  %v2348_v45 = vpop.f32.mrf.mxu0  ;;  %v1003_v57 = vadd.f32 %v1613_v19, %v1002_v35  ;;  %vm1097_vm11 = vweird.f32 %v1615_v46  ;;  %vm1062_vm6 = vcmp.gt.f32.partialorder %v2177_v8, 0.0 }
 0x36c   :  { %v973_v60 = vsel %vm972_vm2, %v1611_v5, %v969_v49  ;;  %v1092_v0 = vmul.f32 %v1615_v46, %v1091_v48  ;;  %v868_v1 = vmax.f32 %v2348_v45, 0.0  ;;  %v873_v14 = vmul.f32 %v1617_v2, %v2321_v33 }
 0x36d   :  { %v1024_v47 = vmul.f32 0.080537446, %v2331_v40  ;;  %v978_v51 = vsel %vm2299_vm10, %v977_v37, %v973_v60  ;;  %v1007_v63 = vsel %vm1006_vm4, %v1613_v19, %v1003_v57  ;;  %vm2371_vm7 = vcmp.eq.f32.partialorder %v881_v58, 8.507059e+37 }
 0x36e   :  { %v979_v10 = vmul.f32 -1.0, %v978_v51  ;;  %v1012_v3 = vsel %vm2337_vm1, %v1011_v50, %v1007_v63  ;;  %v1093_v13 = vmul.f32 0.5, %v1092_v0  ;;  %v884_v7 = vor.u32 1.1754944e-38, %v883_v61 }
 0x36f   :  { %v1551_v59 = vadd.f32 -0.13877685, %v1024_v47  ;;  %v1013_v52 = vmul.f32 %v2278_v11, %v1012_v3  ;;  %v1619_v5 = vpop.eup %1618  ;;  %vm1223_vm10 = vcmask 261120   ;;  %vm891_vm12 = vweird.f32 %v2323_v34 }
 0x370   :  { %v895_v18 = vand.u32 2147483647, %v2323_v34  ;;  %v1094_v11 = vsub.f32 1.5, %v1093_v13  ;;  %v874_v20 = vsub.f32 1.0, %v873_v14  ;;  %v887_v21 = vmul.f32 %v1619_v5, %v2323_v34  ;;  %v2381_v23 = vpop.eup %1620 }
 0x371   :  { %v1028_v9 = vmul.f32 %v1551_v59, %v2331_v40  ;;  %v1015_v19 = vsel %vm2316_vm13, %v1013_v52, %v2225_v38  ;;  %vm878_vm14 = vweird.f32 %v1617_v2  ;;  %v897_v28 = vand.u32 2147483648, %v2323_v34  ;;  %vm1098_vm13 = vmor %vm1096_vm3, %vm1097_vm11 }
 0x372   :  { %v2386_v27 = vsel %vm941_vm15, %v979_v10, %v1015_v19  ;;  %v1095_v30 = vmul.f32 %v1615_v46, %v1094_v11  ;;  %v875_v32 = vmul.f32 %v1617_v2, %v874_v20  ;;  %v888_v37 = vsub.f32 1.0, %v887_v21  ;;  %vm879_vm2 = vmor %vm877_vm5, %vm878_vm14 }
 0x373   :  { %v1030_v6 = vadd.f32 0.19977711, %v1028_v9  ;;  %v2391_v29 = vmul.f32 %v2386_v27, %v2386_v27  ;;  %v865_v42 = vpop.f32.mrf.mxu0  ;;  %vm892_vm9 = vweird.f32 %v1619_v5  ;;  %vm2396_vm1 = vcmp.eq.f32.partialorder %v895_v18, 8.507059e+37 }
 0x374   :  { %v1214_v43 = vlaneseq  ;;  %v1099_v49 = vsel %vm1098_vm13, %v1615_v46, %v1095_v30  ;;  %v876_v50 = vadd.f32 %v1617_v2, %v875_v32  ;;  %v889_v45 = vmul.f32 %v1619_v5, %v888_v37  ;;  %vm893_vm4 = vmor %vm891_vm12, %vm892_vm9 }
 0x375   :  { %v1032_v26 = vmul.f32 %v1030_v6, %v2331_v40  ;;  %v1025_v47 = vmul.f32 0.080537446, %v2391_v29  ;;  %v2403_v48 = vmul.f32 %v1099_v49, %v2163_v54  ;;  %v898_v12 = vor.u32 1.1754944e-38, %v897_v28 }
 0x376   :  { %vm1104_vm3 = vcmp.gt.f32.partialorder %v2306_v53, 2.4142137  ;;  %v880_v59 = vsel %vm879_vm2, %v1617_v2, %v876_v50  ;;  %v869_v60 = vmax.f32 %v865_v42, 0.0  ;;  %v890_v61 = vadd.f32 %v1619_v5, %v889_v45 }
 0x377   :  { %v1553_v39 = vadd.f32 -0.3333295, %v1032_v26  ;;  %v1552_v58 = vadd.f32 -0.13877685, %v1025_v47  ;;  %v2411_v51 = vand.u32 2147483647, %v2403_v48  ;;  %v885_v54 = vsel %vm2371_vm7, %v884_v7, %v880_v59 }
 0x378   :  { %v2418_v33 = vand.u32 127, %v1214_v43  ;;  %v900_v63 = vmul.f32 %v885_v54, %v868_v1  ;;  %v894_v0 = vsel %vm893_vm4, %v1619_v5, %v890_v61  ;;  %v2424_v2 = vsel %vm1104_vm3, %v2306_v53, 1.0 }
 0x379   :  { %v1036_v57 = vmul.f32 %v1553_v39, %v2331_v40  ;;  %v1029_v40 = vmul.f32 %v1552_v58, %v2391_v29  ;;  %vm1052_vm5 = vcmp.ge.f32.partialorder %v2177_v8, 0.0  ;;  %v1068_v34 = vsel %vm1062_vm6, 1.5707964, %v2202_v25 }
 0x37a   :  { %v899_v10 = vsel %vm2396_vm1, %v898_v12, %v894_v0  ;;  %1622 = vrcp.f32 %v2424_v2  ;;  %vm1050_vm11 = vcmp.lt.f32.partialorder %v2165_v55, 0.0  ;;  %v1020_v1 = vsel %vm940_vm0, 1.5707964, %v2260_v62  ;;  %1447 = vst.msk [vmem:[%s2732_s11 + $0x20] sm:$0xff] %vm1223_vm10, %v900_v63 }
 0x37b   :  { %v1038_v46 = vmul.f32 %v1036_v57, %v2327_v36  ;;  %v1031_v3 = vadd.f32 0.19977711, %v1029_v40  ;;  %v901_v25 = vmul.f32 %v899_v10, %v869_v60  ;;  %vm1044_vm6 = vcmp.lt.f32.partialorder %v2182_v4, 0.0 }
 0x37c   :  { %v1021_v13 = vsel %vm941_vm15, 1.5707964, %v2344_v44  ;;  %v1149_v16 = vmul.f32 %v2381_v23, %v2334_v41  ;;  %vm1275_vm0 = vcmp.ge.s32.totalorder %v2418_v33, 16  ;;  %vm1276_vm7 = vcmp.lt.s32.totalorder %v2418_v33, 32 }
 0x37d   :  { %v1040_v9 = vadd.f32 %v1038_v46, %v2327_v36  ;;  %v2439_v36 = vadd.f32 1.0, %v2411_v51  ;;  %v1033_v62 = vmul.f32 %v1031_v3, %v2391_v29  ;;  %1448 = vst.msk [vmem:[%s2732_s11 + $0x28] sm:$0xff] %vm1223_vm10, %v901_v25  ;;  %v1557_v14 = vadd.f32 -1.0, %v2306_v53  ;;  %vm2477_vm9 = vmand %vm1275_vm0, %vm1276_vm7 }
 0x37e   :  { %vm1217_vm12 = vcmp.lt.s32.totalorder %v2418_v33, 16  ;;  %v1150_v38 = vsub.f32 1.0, %v1149_v16  ;;  %v1157_v44 = vand.u32 2147483647, %v2334_v41  ;;  %vm1065_vm15 = vcmp.lt.f32.partialorder %v2199_v22, 0.0 }
 0x37f   :  { %v1042_v52 = vadd.f32 %v1040_v9, %v1020_v1  ;;  %v1554_v5 = vadd.f32 -0.3333295, %v1033_v62  ;;  %1624 = vrcp.f32 %v2439_v36  ;;  %vm1106_vm14 = vcmp.gt.f32.partialorder %v2306_v53, 0.41421357 }
 0x380   :  { %v1123_v6 = vand.u32 2147483647, %v2424_v2  ;;  %v1159_v7 = vand.u32 2147483648, %v2334_v41  ;;  %v1623_v18 = vpop.eup %1622  ;;  %v1125_v11 = vand.u32 2147483648, %v2424_v2  ;;  %v1151_v20 = vmul.f32 %v2381_v23, %v1150_v38 }
 0x381   :  { %v1046_v15 = vsub.f32 0.0, %v1042_v52  ;;  %vm1154_vm13 = vweird.f32 %v2381_v23  ;;  %v1037_v28 = vmul.f32 %v1554_v5, %v2391_v29  ;;  %v1115_v30 = vmul.f32 %v1623_v18, %v2424_v2 }
 0x382   :  { %v1152_v4 = vadd.f32 %v2381_v23, %v1151_v20  ;;  %vm1153_vm1 = vweird.f32 %v2334_v41  ;;  %vm1158_vm2 = vcmp.eq.f32.partialorder %v1157_v44, 8.507059e+37  ;;  %vm1105_vm4 = vcmp.gt.f32.partialorder %v2411_v51, 2.4142137 }
 0x383   :  { %v1048_v19 = vsel %vm1044_vm6, %v1046_v15, %v1042_v52  ;;  %v1039_v37 = vmul.f32 %v1037_v28, %v2386_v27  ;;  %v1116_v39 = vsub.f32 1.0, %v1115_v30  ;;  %vm1155_vm6 = vmor %vm1153_vm1, %vm1154_vm13  ;;  %v1160_v42 = vor.u32 1.1754944e-38, %v1159_v7 }
 0x384   :  { %v1054_v21 = vadd.f32 3.1415927, %v1048_v19  ;;  %v1555_v26 = vadd.f32 -3.1415927, %v1048_v19  ;;  %vm1120_vm0 = vweird.f32 %v1623_v18  ;;  %v1156_v43 = vsel %vm1155_vm6, %v2381_v23, %v1152_v4 }
 0x385   :  { %v2493_v41 = vsel %vm1105_vm4, %v2411_v51, 1.0  ;;  %v2495_v47 = vpop.eup %1624  ;;  %v1041_v8 = vadd.f32 %v1039_v37, %v2386_v27  ;;  %v1117_v50 = vmul.f32 %v1623_v18, %v1116_v39  ;;  %v1161_v45 = vsel %vm1158_vm2, %v1160_v42, %v1156_v43 }
 0x386   :  { %v1058_v29 = vsel %vm1052_vm5, %v1054_v21, %v1555_v26  ;;  %vm2755_vm5 = vcmp.eq.f32.partialorder %v2165_v55, 0.0  ;;  %v1162_v58 = vmul.f32 %v1557_v14, %v1161_v45  ;;  %vm1119_vm7 = vweird.f32 %v2424_v2 }
 0x387   :  { %v1060_v35 = vsel %vm1050_vm11, %v1058_v29, %v1048_v19  ;;  %v1043_v27 = vadd.f32 %v1041_v8, %v1021_v13  ;;  %vm1108_vm11 = vmxor %vm1104_vm3, %vm1799_vm8  ;;  %v1118_v61 = vadd.f32 %v1623_v18, %v1117_v50  ;;  %1626 = vrcp.f32 %v2493_v41 }
 0x388   :  { %v2500_v49 = vsel %vm2755_vm5, %v1068_v34, %v1060_v35  ;;  %vm1063_vm13 = vcmp.gt.f32.partialorder %v2199_v22, 0.0  ;;  %vm1121_vm1 = vmor %vm1119_vm7, %vm1120_vm0  ;;  %v1126_v54 = vor.u32 1.1754944e-38, %v1125_v11  ;;  %v1164_v40 = vmul.f32 %v2495_v47, %v2439_v36 }
 0x389   :  { %v1390_v57 = vsel %vm2477_vm9, %v2500_v49, -3e+38  ;;  %v1337_v23 = vsel %vm1217_vm12, %v2500_v49, 3e+38  ;;  %v1335_v12 = vsel %vm1217_vm12, %v2500_v49, -3e+38  ;;  %vm2529_vm6 = vmand %vm1106_vm14, %vm1108_vm11  ;;  %v1122_v2 = vsel %vm1121_vm1, %v1623_v18, %v1118_v61 }
 0x38a   :  { %v1394_v55 = vsel %vm1223_vm10, %v1390_v57, -inf  ;;  %v1352_v59 = vsel %vm1223_vm10, %v1337_v23, inf  ;;  %v1339_v60 = vsel %vm1223_vm10, %v1335_v12, -inf  ;;  %v1047_v46 = vsub.f32 0.0, %v1043_v27 }
 0x38b   :  { %1395 = vmax.xlane.f32.xlu0 %v1394_v55  ;;  %1353 = vmin.xlane.f32.xlu1 %v1352_v59  ;;  %vm1045_vm2 = vcmp.lt.f32.partialorder %v2213_v31, 0.0  ;;  %v1067_v63 = vsel %vm1065_vm15, -1.5707964, %v1798_v24  ;;  %vm1124_vm5 = vcmp.eq.f32.partialorder %v1123_v6, 8.507059e+37  ;;  %v1178_v10 = vsel %vm2529_vm6, %v1162_v58, %v2306_v53 }
 0x38c   :  { %1340 = vmax.xlane.f32.xlu2 %v1339_v60  ;;  %v1049_v9 = vsel %vm1045_vm2, %v1047_v46, %v1043_v27  ;;  %v1127_v34 = vsel %vm1124_vm5, %v1126_v54, %v1122_v2  ;;  %v1172_v31 = vand.u32 2147483647, %v2439_v36  ;;  %v1165_v52 = vsub.f32 1.0, %v1164_v40 }
 0x38d   :  { %v1055_v1 = vadd.f32 3.1415927, %v1049_v9  ;;  %v1556_v3 = vadd.f32 -3.1415927, %v1049_v9  ;;  %v1128_v25 = vmul.f32 -1.0, %v1127_v34  ;;  %vm1051_vm15 = vcmp.lt.f32.partialorder %v2171_v56, 0.0  ;;  %v1627_v62 = vpop.eup %1626 }
 0x38e   :  { %vm1053_vm14 = vcmp.ge.f32.partialorder %v2199_v22, 0.0  ;;  %v1069_v13 = vsel %vm1063_vm13, 1.5707964, %v1067_v63  ;;  %v1174_v16 = vand.u32 2147483648, %v2439_v36  ;;  %v1166_v38 = vmul.f32 %v2495_v47, %v1165_v52 }
 0x38f   :  { %v1059_v14 = vsel %vm1053_vm14, %v1055_v1, %v1556_v3  ;;  %v1180_v15 = vsel %vm1104_vm3, %v1128_v25, %v1178_v10  ;;  %vm1169_vm0 = vweird.f32 %v2495_v47  ;;  %v1130_v6 = vmul.f32 %v1627_v62, %v2493_v41 }
 0x390   :  { %v1061_v44 = vsel %vm1051_vm15, %v1059_v14, %v1049_v9  ;;  %v1186_v5 = vmul.f32 %v1180_v15, %v1180_v15  ;;  %vm1168_vm11 = vweird.f32 %v2439_v36  ;;  %vm2758_vm7 = vcmp.eq.f32.partialorder %v2171_v56, 0.0  ;;  %vm1109_vm15 = vmxor %vm1105_vm4, %vm1799_vm8 }
 0x391   :  { %v2550_v22 = vsel %vm2758_vm7, %v1069_v13, %v1061_v44  ;;  %v1167_v7 = vadd.f32 %v2495_v47, %v1166_v38  ;;  %vm1173_vm13 = vcmp.eq.f32.partialorder %v1172_v31, 8.507059e+37  ;;  %v1175_v18 = vor.u32 1.1754944e-38, %v1174_v16  ;;  %vm1170_vm1 = vmor %vm1168_vm11, %vm1169_vm0 }
 0x392   :  { %v1338_v19 = vsel %vm1217_vm12, %v2550_v22, 3e+38  ;;  %v1336_v11 = vsel %vm1217_vm12, %v2550_v22, -3e+38  ;;  %v1188_v20 = vmul.f32 0.080537446, %v1186_v5  ;;  %vm1135_vm2 = vweird.f32 %v1627_v62 }
 0x393   :  { %v1355_v36 = vsel %vm1223_vm10, %v1338_v19, inf  ;;  %v1342_v56 = vsel %vm1223_vm10, %v1336_v11, -inf  ;;  %v1131_v21 = vsub.f32 1.0, %v1130_v6  ;;  %v1171_v26 = vsel %vm1170_vm1, %v2495_v47, %v1167_v7 }
 0x394   :  { %1356 = vmin.xlane.f32.xlu2 %v1355_v36  ;;  %1343 = vmax.xlane.f32.xlu0 %v1342_v56  ;;  %v1559_v28 = vadd.f32 -0.13877685, %v1188_v20  ;;  %v1140_v30 = vand.u32 2147483648, %v2493_v41  ;;  %v1558_v4 = vadd.f32 -1.0, %v2411_v51  ;;  %v1176_v29 = vsel %vm1173_vm13, %v1175_v18, %v1171_v26 }
 0x395   :  { %v1132_v37 = vmul.f32 %v1627_v62, %v1131_v21  ;;  %v1138_v39 = vand.u32 2147483647, %v2493_v41  ;;  %vm1107_vm5 = vcmp.gt.f32.partialorder %v2411_v51, 0.41421357  ;;  %vm1134_vm14 = vweird.f32 %v2493_v41 }
 0x396   :  { %v1192_v42 = vmul.f32 %v1559_v28, %v1186_v5  ;;  %v1177_v35 = vmul.f32 %v1558_v4, %v1176_v29  ;;  %vm1136_vm0 = vmor %vm1134_vm14, %vm1135_vm2  ;;  %v1141_v8 = vor.u32 1.1754944e-38, %v1140_v30  ;;  %v1182_v60 = vsel %vm2529_vm6, 0.7853982, %v1798_v24 }
 0x397   :  { %v1133_v43 = vadd.f32 %v1627_v62, %v1132_v37  ;;  %vm2570_vm11 = vmand %vm1107_vm5, %vm1109_vm15  ;;  %vm1139_vm7 = vcmp.eq.f32.partialorder %v1138_v39, 8.507059e+37  ;;  %v1184_v63 = vsel %vm1104_vm3, 1.5707964, %v1182_v60  ;;  %vm1208_vm8 = vcmp.lt.f32.partialorder %v2291_v17, 0.0 }
 0x398   :  { %v1194_v47 = vadd.f32 0.19977711, %v1192_v42  ;;  %v1179_v12 = vsel %vm2570_vm11, %v1177_v35, %v2411_v51  ;;  %vm1209_vm3 = vcmp.lt.f32.partialorder %v2403_v48, 0.0  ;;  %v1392_v56 = vsel %vm2477_vm9, %v2500_v49, 3e+38 }
 0x399   :  { %v1137_v45 = vsel %vm1136_vm0, %v1627_v62, %v1133_v43  ;;  %v1183_v62 = vsel %vm2570_vm11, 0.7853982, %v1798_v24  ;;  %v1407_v26 = vsel %vm1223_vm10, %v1392_v56, inf  ;;  %v1393_v28 = vsel %vm2477_vm9, %v2550_v22, 3e+38 }
 0x39a   :  { %v1196_v57 = vmul.f32 %v1194_v47, %v1186_v5  ;;  %v1142_v23 = vsel %vm1139_vm7, %v1141_v8, %v1137_v45  ;;  %v1185_v44 = vsel %vm1105_vm4, 1.5707964, %v1183_v62  ;;  %v1410_v30 = vsel %vm1223_vm10, %v1393_v28, inf }
 0x39b   :  { %v1143_v58 = vmul.f32 -1.0, %v1142_v23  ;;  %v1391_v4 = vsel %vm2477_vm9, %v2550_v22, -3e+38 }
 0x39c   :  { %v1561_v27 = vadd.f32 -0.3333295, %v1196_v57  ;;  %v1397_v29 = vsel %vm1223_vm10, %v1391_v4, -inf }
 0x39d   :  { %v1181_v41 = vsel %vm1105_vm4, %v1143_v58, %v1179_v12 }
 0x39e   :  { %v1200_v55 = vmul.f32 %v1561_v27, %v1186_v5  ;;  %v1187_v59 = vmul.f32 %v1181_v41, %v1181_v41 }
 0x3a0   :  { %v1202_v61 = vmul.f32 %v1200_v55, %v1180_v15  ;;  %v1189_v46 = vmul.f32 0.080537446, %v1187_v59 }
 0x3a2   :  { %v1204_v54 = vadd.f32 %v1202_v61, %v1180_v15  ;;  %v1560_v40 = vadd.f32 -0.13877685, %v1189_v46 }
 0x3a4   :  { %v1206_v2 = vadd.f32 %v1204_v54, %v1184_v63  ;;  %v1193_v9 = vmul.f32 %v1560_v40, %v1187_v59 }
 0x3a6   :  { %v1210_v34 = vsub.f32 0.0, %v1206_v2  ;;  %v1195_v10 = vadd.f32 0.19977711, %v1193_v9 }
 0x3a8   :  { %v2585_v31 = vsel %vm1208_vm8, %v1210_v34, %v1206_v2  ;;  %v1197_v1 = vmul.f32 %v1195_v10, %v1187_v59 }
 0x3a9   :  { %v1221_v0 = vsel %vm1217_vm12, %v2585_v31, 3e+38  ;;  %v1278_v3 = vsel %vm2477_vm9, %v2585_v31, -3e+38  ;;  %v1219_v53 = vsel %vm1217_vm12, %v2585_v31, -3e+38 }
 0x3aa   :  { %v1237_v25 = vsel %vm1223_vm10, %v1221_v0, inf  ;;  %v1282_v52 = vsel %vm1223_vm10, %v1278_v3, -inf  ;;  %v1224_v17 = vsel %vm1223_vm10, %v1219_v53, -inf  ;;  %v1562_v13 = vadd.f32 -0.3333295, %v1197_v1 }
 0x3ab   :  { %1238 = vmin.xlane.f32.xlu1 %v1237_v25  ;;  %1283 = vmax.xlane.f32.xlu2 %v1282_v52  ;;  %v1280_v38 = vsel %vm2477_vm9, %v2585_v31, 3e+38 }
 0x3ac   :  { %1225 = vmax.xlane.f32.xlu0 %v1224_v17  ;;  %v1201_v16 = vmul.f32 %v1562_v13, %v1187_v59  ;;  %v1295_v6 = vsel %vm1223_vm10, %v1280_v38, inf }
 0x3ae   :  { %v1203_v14 = vmul.f32 %v1201_v16, %v1181_v41 }
 0x3b0   :  { %v1205_v15 = vadd.f32 %v1203_v14, %v1181_v41 }
 0x3b2   :  { %v1207_v5 = vadd.f32 %v1205_v15, %v1185_v44 }
 0x3b4   :  { %v1211_v7 = vsub.f32 0.0, %v1207_v5  ;;  %1296 = vmin.xlane.f32.xlu0 %v1295_v6 }
 0x3b6   :  { %v2609_v18 = vsel %vm1209_vm3, %v1211_v7, %v1207_v5 }
 0x3b7   :  { %v1222_v24 = vsel %vm1217_vm12, %v2609_v18, 3e+38  ;;  %v1279_v19 = vsel %vm2477_vm9, %v2609_v18, -3e+38  ;;  %v1220_v20 = vsel %vm1217_vm12, %v2609_v18, -3e+38 }
 0x3b8   :  { %v1240_v51 = vsel %vm1223_vm10, %v1222_v24, inf  ;;  %v1285_v11 = vsel %vm1223_vm10, %v1279_v19, -inf  ;;  %v1227_v48 = vsel %vm1223_vm10, %v1220_v20, -inf  ;;  %v1281_v36 = vsel %vm2477_vm9, %v2609_v18, 3e+38 }
 0x3b9   :  { %1241 = vmin.xlane.f32.xlu1 %v1240_v51  ;;  %1286 = vmax.xlane.f32.xlu2 %v1285_v11  ;;  %v1298_v21 = vsel %vm1223_vm10, %v1281_v36, inf }
 0x3bc   :  { %1228 = vmax.xlane.f32.xlu0 %v1227_v48 }
 0x3c1   :  { %1299 = vmin.xlane.f32.xlu1 %v1298_v21  ;;  %1408 = vmin.xlane.f32.xlu2 %v1407_v26 }
 0x3c4   :  { %1411 = vmin.xlane.f32.xlu0 %v1410_v30 }
 0x3c9   :  { %1398 = vmax.xlane.f32.xlu1 %v1397_v29 }
 0x3fe   :  { %v1396_v37 = vpop.xlane.xlu0 %1395  ;;  %v1354_v43 = vpop.xlane.xlu1 %1353 }
 0x3ff   :  { %v1341_v39 = vpop.xlane.xlu2 %1340 }
 0x407   :  { %v1357_v42 = vpop.xlane.xlu2 %1356  ;;  %v1344_v35 = vpop.xlane.xlu0 %1343 }
 0x408   :  { %v1358_v47 = vmin.f32 %v1354_v43, %v1357_v42  ;;  %v1345_v8 = vmax.f32 %v1341_v39, %v1344_v35 }
 0x40a   :  { %v1359_v50 = vrot.slane %v1358_v47, 4  ;;  %v1346_v45 = vrot.slane %v1345_v8, 4 }
 0x40c   :  { %v1360_v57 = vmin.f32 %v1358_v47, %v1359_v50  ;;  %v1347_v23 = vmax.f32 %v1345_v8, %v1346_v45 }
 0x40e   :  { %v1361_v58 = vrot.slane %v1360_v57, 2  ;;  %v1348_v27 = vrot.slane %v1347_v23, 2 }
 0x410   :  { %v1362_v59 = vmin.f32 %v1360_v57, %v1361_v58  ;;  %v1349_v60 = vmax.f32 %v1347_v23, %v1348_v27 }
 0x412   :  { %v1363_v46 = vrot.slane %v1362_v59, 1  ;;  %v1350_v54 = vrot.slane %v1349_v60, 1 }
 0x414   :  { %v2639_v40 = vmin.f32 %v1362_v59, %v1363_v46  ;;  %v1351_v63 = vmax.f32 %v1349_v60, %v1350_v54 }
 0x416   :  { %v1365_v53 = vsub.f32 %v1351_v63, %v2639_v40 }
 0x418   :  { %vm1366_vm4 = vcmp.eq.f32.partialorder %v1365_v53, 0.0 }
 0x419   :  { %v2642_v6 = vsel %vm1366_vm4, 1.0, %v1365_v53 }
 0x41a   :  { %1628 = vrcp.f32 %v2642_v6  ;;  %vm1373_vm7 = vweird.f32 %v2642_v6 }
 0x41e   :  { %v1239_v41 = vpop.xlane.xlu1 %1238  ;;  %v1284_v55 = vpop.xlane.xlu2 %1283 }
 0x41f   :  { %v1226_v12 = vpop.xlane.xlu0 %1225 }
 0x420   :  { %v2648_v45 = vpop.eup %1628 }
 0x421   :  { %vm1374_vm2 = vweird.f32 %v2648_v45 }
 0x422   :  { %vm2670_vm8 = vmor %vm1373_vm7, %vm1374_vm2 }
 0x427   :  { %v1297_v61 = vpop.xlane.xlu0 %1296 }
 0x42c   :  { %v1242_v2 = vpop.xlane.xlu1 %1241  ;;  %v1287_v9 = vpop.xlane.xlu2 %1286 }
 0x42d   :  { %v1243_v34 = vmin.f32 %v1239_v41, %v1242_v2  ;;  %v1288_v10 = vmax.f32 %v1284_v55, %v1287_v9  ;;  %v1369_v41 = vmul.f32 %v2648_v45, %v2642_v6 }
 0x42f   :  { %v1244_v1 = vrot.slane %v1243_v34, 4  ;;  %v1289_v0 = vrot.slane %v1288_v10, 4  ;;  %v1229_v3 = vpop.xlane.xlu0 %1228  ;;  %v1370_v46 = vsub.f32 1.0, %v1369_v41 }
 0x430   :  { %v1230_v25 = vmax.f32 %v1226_v12, %v1229_v3 }
 0x431   :  { %v1245_v52 = vmin.f32 %v1243_v34, %v1244_v1  ;;  %v1290_v17 = vmax.f32 %v1288_v10, %v1289_v0  ;;  %v1371_v10 = vmul.f32 %v2648_v45, %v1370_v46 }
 0x432   :  { %v1231_v13 = vrot.slane %v1230_v25, 4 }
 0x433   :  { %v1246_v16 = vrot.slane %v1245_v52, 2  ;;  %v1291_v38 = vrot.slane %v1290_v17, 2 }
 0x434   :  { %v1300_v62 = vpop.xlane.xlu1 %1299  ;;  %v1232_v14 = vmax.f32 %v1230_v25, %v1231_v13  ;;  %v1409_v24 = vpop.xlane.xlu2 %1408  ;;  %v1372_v13 = vadd.f32 %v2648_v45, %v1371_v10 }
 0x435   :  { %v1247_v15 = vmin.f32 %v1245_v52, %v1246_v16  ;;  %v1301_v44 = vmin.f32 %v1297_v61, %v1300_v62  ;;  %v1292_v48 = vmax.f32 %v1290_v17, %v1291_v38 }
 0x436   :  { %v1233_v5 = vrot.slane %v1232_v14, 2 }
 0x437   :  { %v1302_v7 = vrot.slane %v1301_v44, 4  ;;  %v1412_v19 = vpop.xlane.xlu0 %1411  ;;  %v1248_v51 = vrot.slane %v1247_v15, 1  ;;  %v1293_v39 = vrot.slane %v1292_v48, 1 }
 0x438   :  { %v1234_v11 = vmax.f32 %v1232_v14, %v1233_v5  ;;  %v1413_v20 = vmin.f32 %v1409_v24, %v1412_v19 }
 0x439   :  { %v1303_v36 = vmin.f32 %v1301_v44, %v1302_v7  ;;  %v2645_v28 = vmin.f32 %v1247_v15, %v1248_v51  ;;  %v1294_v23 = vmax.f32 %v1292_v48, %v1293_v39 }
 0x43a   :  { %v1235_v56 = vrot.slane %v1234_v11, 1  ;;  %v1414_v21 = vrot.slane %v1413_v20, 4 }
 0x43b   :  { %v1304_v26 = vrot.slane %v1303_v36, 2  ;;  %v1267_v14 = vsub.f32 %v2585_v31, %v2645_v28  ;;  %v1268_v44 = vsub.f32 %v2609_v18, %v2645_v28 }
 0x43c   :  { %v1236_v30 = vmax.f32 %v1234_v11, %v1235_v56  ;;  %v1399_v4 = vpop.xlane.xlu1 %1398  ;;  %v1415_v29 = vmin.f32 %v1413_v20, %v1414_v21  ;;  %v1377_v11 = vand.u32 2147483647, %v2642_v6  ;;  %v1379_v20 = vand.u32 2147483648, %v2642_v6 }
 0x43d   :  { %v1305_v42 = vmin.f32 %v1303_v36, %v1304_v26  ;;  %v1400_v35 = vmax.f32 %v1396_v37, %v1399_v4  ;;  %v1376_v26 = vsel %vm2670_vm8, %v2648_v45, %v1372_v13 }
 0x43e   :  { %v1250_v43 = vsub.f32 %v1236_v30, %v2645_v28  ;;  %v1416_v47 = vrot.slane %v1415_v29, 2  ;;  %v1380_v39 = vor.u32 1.1754944e-38, %v1379_v20 }
 0x43f   :  { %v1306_v8 = vrot.slane %v1305_v42, 1  ;;  %v1401_v50 = vrot.slane %v1400_v35, 4 }
 0x440   :  { %vm1251_vm6 = vcmp.eq.f32.partialorder %v1250_v43, 0.0  ;;  %v1417_v57 = vmin.f32 %v1415_v29, %v1416_v47 }
 0x441   :  { %v2650_v12 = vmin.f32 %v1305_v42, %v1306_v8  ;;  %v1252_v58 = vsel %vm1251_vm6, 1.0, %v1250_v43  ;;  %v1402_v27 = vmax.f32 %v1400_v35, %v1401_v50 }
 0x442   :  { %1630 = vrcp.f32 %v1252_v58  ;;  %v1418_v59 = vrot.slane %v1417_v57, 1  ;;  %v1264_v0 = vand.u32 2147483648, %v1252_v58  ;;  %v1262_v52 = vand.u32 2147483647, %v1252_v58 }
 0x443   :  { %v1308_v37 = vsub.f32 %v1294_v23, %v2650_v12  ;;  %v1403_v55 = vrot.slane %v1402_v27, 2  ;;  %vm1258_vm15 = vweird.f32 %v1252_v58  ;;  %v1325_v6 = vsub.f32 %v2585_v31, %v2650_v12 }
 0x444   :  { %v2655_v2 = vmin.f32 %v1417_v57, %v1418_v59  ;;  %v1265_v38 = vor.u32 1.1754944e-38, %v1264_v0  ;;  %vm1263_vm0 = vcmp.eq.f32.partialorder %v1262_v52, 8.507059e+37  ;;  %v1326_v29 = vsub.f32 %v2609_v18, %v2650_v12 }
 0x445   :  { %vm1309_vm13 = vcmp.eq.f32.partialorder %v1308_v37, 0.0  ;;  %v1404_v60 = vmax.f32 %v1402_v27, %v1403_v55  ;;  %v1383_v55 = vsub.f32 %v2550_v22, %v2639_v40 }
 0x446   :  { %v1310_v61 = vsel %vm1309_vm13, 1.0, %v1308_v37  ;;  %vm1378_vm13 = vcmp.eq.f32.partialorder %v1377_v11, 8.507059e+37  ;;  %v1382_v37 = vsub.f32 %v2500_v49, %v2639_v40  ;;  %v1437_v40 = vsub.f32 %v2500_v49, %v2655_v2 }
 0x447   :  { %1632 = vrcp.f32 %v1310_v61  ;;  %v1405_v63 = vrot.slane %v1404_v60, 1  ;;  %v1322_v5 = vand.u32 2147483648, %v1310_v61  ;;  %v1320_v19 = vand.u32 2147483647, %v1310_v61 }
 0x448   :  { %v1631_v54 = vpop.eup %1630  ;;  %vm1316_vm3 = vweird.f32 %v1310_v61  ;;  %v1381_v45 = vsel %vm1378_vm13, %v1380_v39, %v1376_v26 }
 0x449   :  { %v1254_v9 = vmul.f32 %v1631_v54, %v1252_v58  ;;  %v1406_v34 = vmax.f32 %v1404_v60, %v1405_v63  ;;  %vm1259_vm1 = vweird.f32 %v1631_v54  ;;  %v1323_v28 = vor.u32 1.1754944e-38, %v1322_v5 }
 0x44a   :  { %vm1260_vm14 = vmor %vm1258_vm15, %vm1259_vm1  ;;  %vm1321_vm6 = vcmp.eq.f32.partialorder %v1320_v19, 8.507059e+37  ;;  %v1384_v60 = vmul.f32 %v1382_v37, %v1381_v45  ;;  %v1438_v63 = vsub.f32 %v2550_v22, %v2655_v2 }
 0x44b   :  { %v1255_v1 = vsub.f32 1.0, %v1254_v9  ;;  %v1420_v3 = vsub.f32 %v1406_v34, %v2655_v2 }
 0x44d   :  { %v1633_v53 = vpop.eup %1632  ;;  %v1256_v25 = vmul.f32 %v1631_v54, %v1255_v1  ;;  %vm1421_vm5 = vcmp.eq.f32.partialorder %v1420_v3, 0.0  ;;  %v1386_v1 = vsel %vm1217_vm12, %v1384_v60, 0.0 }
 0x44e   :  { %v1312_v17 = vmul.f32 %v1633_v53, %v1310_v61  ;;  %v1422_v62 = vsel %vm1421_vm5, 1.0, %v1420_v3  ;;  %vm1317_vm11 = vweird.f32 %v1633_v53  ;;  %v1385_v61 = vmul.f32 %v1383_v55, %v1381_v45 }
 0x44f   :  { %v1257_v16 = vadd.f32 %v1631_v54, %v1256_v25  ;;  %1634 = vrcp.f32 %v1422_v62  ;;  %vm1318_vm4 = vmor %vm1316_vm3, %vm1317_vm11  ;;  %v1432_v23 = vand.u32 2147483647, %v1422_v62  ;;  %v1434_v12 = vand.u32 2147483648, %v1422_v62 }
 0x450   :  { %v1313_v15 = vsub.f32 1.0, %v1312_v17  ;;  %vm1428_vm2 = vweird.f32 %v1422_v62  ;;  %v1387_v0 = vsel %vm1217_vm12, %v1385_v61, 0.0 }
 0x451   :  { %v1261_v7 = vsel %vm1260_vm14, %v1631_v54, %v1257_v16  ;;  %v1435_v46 = vor.u32 1.1754944e-38, %v1434_v12  ;;  %vm1433_vm15 = vcmp.eq.f32.partialorder %v1432_v23, 8.507059e+37 }
 0x452   :  { %v1314_v24 = vmul.f32 %v1633_v53, %v1313_v15  ;;  %v1266_v51 = vsel %vm1263_vm0, %v1265_v38, %v1261_v7 }
 0x453   :  { %v1269_v56 = vmul.f32 %v1267_v14, %v1266_v51  ;;  %v1270_v21 = vmul.f32 %v1268_v44, %v1266_v51 }
 0x454   :  { %v1315_v36 = vadd.f32 %v1633_v53, %v1314_v24 }
 0x455   :  { %v1635_v30 = vpop.eup %1634  ;;  %v1271_v8 = vsel %vm1217_vm12, %v1269_v56, 0.0  ;;  %v1272_v50 = vsel %vm1217_vm12, %v1270_v21, 0.0 }
 0x456   :  { %v1319_v4 = vsel %vm1318_vm4, %v1633_v53, %v1315_v36  ;;  %v1424_v35 = vmul.f32 %v1635_v30, %v1422_v62  ;;  %vm1429_vm1 = vweird.f32 %v1635_v30 }
 0x457   :  { %v1324_v42 = vsel %vm1321_vm6, %v1323_v28, %v1319_v4  ;;  %vm1430_vm5 = vmor %vm1428_vm2, %vm1429_vm1 }
 0x458   :  { %v1327_v43 = vmul.f32 %v1325_v6, %v1324_v42  ;;  %v1328_v47 = vmul.f32 %v1326_v29, %v1324_v42  ;;  %v1425_v57 = vsub.f32 1.0, %v1424_v35 }
 0x45a   :  { %v1329_v31 = vsel %vm2477_vm9, %v1327_v43, 0.0  ;;  %v1330_v18 = vsel %vm2477_vm9, %v1328_v47, 0.0  ;;  %v1426_v41 = vmul.f32 %v1635_v30, %v1425_v57 }
 0x45b   :  { %v1331_v58 = vadd.f32 %v1329_v31, %v1271_v8  ;;  %v1332_v27 = vadd.f32 %v1330_v18, %v1272_v50 }
 0x45c   :  { %v1427_v59 = vadd.f32 %v1635_v30, %v1426_v41 }
 0x45d   :  { %1333 = vst.msk [vmem:[%s2732_s11] sm:$0xff] %vm1223_vm10, %v1331_v58 }
 0x45e   :  { %1334 = vst.msk [vmem:[%s2732_s11 + $0x8] sm:$0xff] %vm1223_vm10, %v1332_v27  ;;  %v1431_v54 = vsel %vm1430_vm5, %v1635_v30, %v1427_v59 }
 0x45f   :  { %v1436_v9 = vsel %vm1433_vm15, %v1435_v46, %v1431_v54 }
 0x460   :  { %v1439_v34 = vmul.f32 %v1437_v40, %v1436_v9  ;;  %v1440_v10 = vmul.f32 %v1438_v63, %v1436_v9 }
 0x462   :  { %v1441_v3 = vsel %vm2477_vm9, %v1439_v34, 0.0  ;;  %v1442_v53 = vsel %vm2477_vm9, %v1440_v10, 0.0 }
 0x463   :  { %v1443_v25 = vadd.f32 %v1441_v3, %v1386_v1  ;;  %v1444_v49 = vadd.f32 %v1442_v53, %v1387_v0 }
 0x465   :  { %1445 = vst.msk [vmem:[%s2732_s11 + $0x10] sm:$0xff] %vm1223_vm10, %v1443_v25 }
 0x466   :  { %1446 = vst.msk [vmem:[%s2732_s11 + $0x18] sm:$0xff] %vm1223_vm10, %v1444_v49 }
 0x467   :  { %1453 = vsyncpa [#allocation4], 1 }
 0x468   :  { %1454 = vsyncpa [#allocation6], 1 }
 0x469   :  { %1455 = vsyncpa [#allocation9], 1 }
 0x46a   :  { %1456 = vsyncpa [#allocation12], 1 }

</bundles_post_ra>
